<compile_context>
chip_gen: v7x
topology: tpu7x:2x2x1
jax: 0.10.0
libtpu: 0.0.40
codegen_flags: <defaults>
</compile_context>

<pallas_src>
import jax
import jax.numpy as jnp
from jax.experimental import pallas as pl
from jax.experimental.pallas import tpu as pltpu


def _round_up(x, m):
    return ((x + m - 1) // m) * m


# ----------------------------- Pallas kernels ------------------------------

def _conv_gemm_kernel(w_ref, a_ref, b_ref, o_ref):
    # out (Cout, tn) = W (Cout, K) @ cols (K, tn) + bias, ReLU. Lane dim = spatial.
    acc = jnp.dot(w_ref[...], a_ref[...], preferred_element_type=jnp.float32)
    o_ref[...] = jnp.maximum(acc + b_ref[...], 0.0).astype(o_ref.dtype)


def _fc_twin_kernel(x_ref, w1_ref, b1_ref, w2_ref, b2_ref, w3_ref, b3_ref, o_ref):
    # Fused twin-Q MLP: relu(x@W1+b1) -> relu(.@W2+b2) -> .@W3+b3
    h = jnp.dot(x_ref[...], w1_ref[...], preferred_element_type=jnp.float32) + b1_ref[...]
    h = jnp.maximum(h, 0.0)
    h = jnp.dot(h, w2_ref[...], preferred_element_type=jnp.float32) + b2_ref[...]
    h = jnp.maximum(h, 0.0)
    o = jnp.dot(h, w3_ref[...], preferred_element_type=jnp.float32) + b3_ref[...]
    o_ref[...] = o.astype(o_ref.dtype)


# ------------------------- conv = im2col + GEMM ---------------------------

def _im2col_t(x, kh, kw, stride):
    """x: (C, B, H, W) -> cols (C*kh*kw, B*oh*ow), valid padding."""
    C, B, H, W = x.shape
    oh = (H - kh) // stride + 1
    ow = (W - kw) // stride + 1
    patches = []
    for i in range(kh):
        for j in range(kw):
            patches.append(x[:, :, i:i + stride * oh:stride, j:j + stride * ow:stride])
    cols = jnp.stack(patches, axis=0).reshape(kh, kw, C, B, oh, ow)
    cols = cols.transpose(2, 0, 1, 3, 4, 5).reshape(C * kh * kw, B * oh * ow)
    return cols, oh, ow


def conv2d_relu_t(x, w, b, stride, *, tn_max=4096):
    """x: (Cin, B, H, W); w: (Cout, Cin, kh, kw); b: (Cout,).
    Returns ReLU(conv(x)) in channel-major layout (Cout, B, oh, ow)."""
    C, B, H, W = x.shape
    cout, cin, kh, kw = w.shape
    assert cin == C, (cin, C)
    cols, oh, ow = _im2col_t(x, kh, kw, stride)          # (K, M)
    K, M = cols.shape
    # Single lane-dense block if it fits the VMEM budget; otherwise tile at tn_max.
    tn = min(tn_max, _round_up(M, 128))
    m_pad = pl.cdiv(M, tn) * tn
    cols = jnp.pad(cols, ((0, 0), (0, m_pad - M)))
    w2 = w.reshape(cout, K)
    b2 = b.reshape(cout, 1)

    out = pl.pallas_call(
        _conv_gemm_kernel,
        out_shape=jax.ShapeDtypeStruct((cout, m_pad), jnp.float32),
        grid_spec=pltpu.PrefetchScalarGridSpec(
            num_scalar_prefetch=0,
            grid=(m_pad // tn,),
            in_specs=[
                pl.BlockSpec((cout, K), lambda i: (0, 0)),   # weights (resident)
                pl.BlockSpec((K, tn), lambda i: (0, i)),     # activation tile
                pl.BlockSpec((cout, 1), lambda i: (0, 0)),   # bias column
            ],
            out_specs=pl.BlockSpec((cout, tn), lambda i: (0, i)),
        ),
        compiler_params=pltpu.CompilerParams(
            dimension_semantics=("parallel",)),
    )(w2, cols, b2)
    out = out[:, :M]
    return out.reshape(cout, B, oh, ow)


# -------------------------- fused twin-Q FC stack ---------------------------

def fc_twin_heads(s_a, fp, *, tm_max=512):
    """s_a: (M, fc_in). Returns q1, q2 each (M, 1) via one fused Pallas call."""
    M, k_in = s_a.shape
    kp, nh = fp["w1"].shape          # padded K, 2*hidden
    nout = fp["w3"].shape[1]         # 128 (cols 0/1 real)
    tm = min(tm_max, _round_up(M, 8))
    m_pad = pl.cdiv(M, tm) * tm
    x = jnp.pad(s_a, ((0, m_pad - M), (0, kp - k_in)))

    out = pl.pallas_call(
        _fc_twin_kernel,
        out_shape=jax.ShapeDtypeStruct((m_pad, nout), jnp.float32),
        grid_spec=pltpu.PrefetchScalarGridSpec(
            num_scalar_prefetch=0,
            grid=(m_pad // tm,),
            in_specs=[
                pl.BlockSpec((tm, kp), lambda i: (i, 0)),
                pl.BlockSpec((kp, nh), lambda i: (0, 0)),
                pl.BlockSpec((1, nh), lambda i: (0, 0)),
                pl.BlockSpec((nh, nh), lambda i: (0, 0)),
                pl.BlockSpec((1, nh), lambda i: (0, 0)),
                pl.BlockSpec((nh, nout), lambda i: (0, 0)),
                pl.BlockSpec((1, nout), lambda i: (0, 0)),
            ],
            out_specs=pl.BlockSpec((tm, nout), lambda i: (i, 0)),
        ),
        compiler_params=pltpu.CompilerParams(
            dimension_semantics=("parallel",)),
    )(x, fp["w1"], fp["b1"], fp["w2"], fp["b2"], fp["w3"], fp["b3"])

    q1 = out[:M, 0:1]
    q2 = out[:M, 1:2]
    return q1, q2


# ----------------------------- Critic params ------------------------------

def init_critic_params(key, state_dim, action_dim, hidden_dim):
    # Conv output size math from the module (input 96 x 128):
    #   96x128 -> 23x31 -> 10x14 -> 8x12 ; fc1_input_dim = 8*8*12 = 768
    fc1_in = 8 * 8 * 12 + state_dim + action_dim
    keys = jax.random.split(key, 16)
    orth = jax.nn.initializers.orthogonal()

    def lin(k, din, dout):
        # PyTorch Linear weight is (out, in); we store the (in, out) transpose.
        return orth(k, (dout, din), jnp.float32).T, jnp.zeros((dout,), jnp.float32)

    p = {}
    p["c1w"] = 0.05 * jax.random.normal(keys[0], (8, 1, 8, 8), jnp.float32)
    p["c1b"] = jnp.zeros((8,), jnp.float32)
    p["c2w"] = 0.05 * jax.random.normal(keys[1], (8, 8, 4, 4), jnp.float32)
    p["c2b"] = jnp.zeros((8,), jnp.float32)
    p["c3w"] = 0.05 * jax.random.normal(keys[2], (8, 8, 3, 3), jnp.float32)
    p["c3b"] = jnp.zeros((8,), jnp.float32)
    p["fc1w"], p["fc1b"] = lin(keys[3], fc1_in, hidden_dim)
    p["fc2w"], p["fc2b"] = lin(keys[4], hidden_dim, hidden_dim)
    p["fc3w"], p["fc3b"] = lin(keys[5], hidden_dim, 1)
    p["fc4w"], p["fc4b"] = lin(keys[6], fc1_in, hidden_dim)
    p["fc5w"], p["fc5b"] = lin(keys[7], hidden_dim, hidden_dim)
    p["fc6w"], p["fc6b"] = lin(keys[8], hidden_dim, 1)
    return p


def prepare_fused_fc(p):
    """Build the fused twin-head FC weights (done once, outside the hot path)."""
    hd = p["fc1b"].shape[0]
    fc_in = p["fc1w"].shape[0]
    kp = _round_up(fc_in, 128)               # lane-align the K dim
    nout = 128                               # 2 real output columns, lane-padded

    w1 = jnp.concatenate([p["fc1w"], p["fc4w"]], axis=1)         # (fc_in, 2H)
    w1 = jnp.pad(w1, ((0, kp - fc_in), (0, 0)))
    b1 = jnp.concatenate([p["fc1b"], p["fc4b"]])[None, :]

    z = jnp.zeros((hd, hd), jnp.float32)
    w2 = jnp.block([[p["fc2w"], z], [z, p["fc5w"]]])             # (2H, 2H)
    b2 = jnp.concatenate([p["fc2b"], p["fc5b"]])[None, :]

    z1 = jnp.zeros((hd, 1), jnp.float32)
    w3 = jnp.block([[p["fc3w"], z1], [z1, p["fc6w"]]])           # (2H, 2)
    w3 = jnp.pad(w3, ((0, 0), (0, nout - 2)))
    b3 = jnp.pad(jnp.concatenate([p["fc3b"], p["fc6b"]]), (0, nout - 2))[None, :]
    return {"w1": w1, "b1": b1, "w2": w2, "b2": b2, "w3": w3, "b3": b3}


# ----------------------------- Critic forward -----------------------------

def _critic_forward(params, fused, pixel, state, a):
    # pixel: (batch, N_drones, 96, 128); state: (batch, N, Ds); a: (batch, N, Da)
    batch, n = pixel.shape[0], pixel.shape[1]
    B = batch * n
    x = pixel.reshape(B, 1, pixel.shape[2], pixel.shape[3])
    s = state.reshape(B, -1)
    act = a.reshape(B, -1)

    # channel-major (C, B, H, W) layout keeps the Pallas conv GEMM lane-dense
    x = jnp.transpose(x, (1, 0, 2, 3))
    x = conv2d_relu_t(x, params["c1w"], params["c1b"], 4)
    x = conv2d_relu_t(x, params["c2w"], params["c2b"], 2)
    x = conv2d_relu_t(x, params["c3w"], params["c3b"], 1)
    flat = jnp.transpose(x, (1, 0, 2, 3)).reshape(B, -1)   # NCHW flatten order

    s_a = jnp.concatenate([flat, s, act], axis=1)
    q1, q2 = fc_twin_heads(s_a, fused)
    return q1.reshape(batch, n, -1), q2.reshape(batch, n, -1)


critic_forward = jax.jit(_critic_forward)


# ----------------------- pure-JAX reference (check) ------------------------

def _ref_linear(x, w, b, relu):
    y = x @ w + b
    return jnp.maximum(y, 0.0) if relu else y


def _ref_conv_relu(x, w, b, stride):
    # x: (B, Cin, H, W) NCHW
    cout, cin, kh, kw = w.shape
    B, C, H, W = x.shape
    oh = (H - kh) // stride + 1
    ow = (W - kw) // stride + 1
    cols = []
    for i in range(kh):
        for j in range(kw):
            cols.append(x[:, :, i:i + stride * oh:stride, j:j + stride * ow:stride])
    cols = jnp.stack(cols, 0).reshape(kh, kw, B, C, oh, ow)
    cols = cols.transpose(2, 4, 5, 3, 0, 1).reshape(B * oh * ow, C * kh * kw)
    y = _ref_linear(cols, w.reshape(cout, -1).T, b, True)
    return y.reshape(B, oh, ow, cout).transpose(0, 3, 1, 2)


def critic_forward_ref(params, pixel, state, a):
    batch, n = pixel.shape[0], pixel.shape[1]
    x = pixel.reshape(batch * n, 1, pixel.shape[2], pixel.shape[3])
    s = state.reshape(batch * n, -1)
    act = a.reshape(batch * n, -1)
    x = _ref_conv_relu(x, params["c1w"], params["c1b"], 4)
    x = _ref_conv_relu(x, params["c2w"], params["c2b"], 2)
    x = _ref_conv_relu(x, params["c3w"], params["c3b"], 1)
    x = x.reshape(x.shape[0], -1)
    s_a = jnp.concatenate([x, s, act], axis=1)
    q1 = _ref_linear(s_a, params["fc1w"], params["fc1b"], True)
    q1 = _ref_linear(q1, params["fc2w"], params["fc2b"], True)
    q1 = _ref_linear(q1, params["fc3w"], params["fc3b"], False)
    q2 = _ref_linear(s_a, params["fc4w"], params["fc4b"], True)
    q2 = _ref_linear(q2, params["fc5w"], params["fc5b"], True)
    q2 = _ref_linear(q2, params["fc6w"], params["fc6b"], False)
    return q1.reshape(batch, n, -1), q2.reshape(batch, n, -1)


# --------------------------------- main ------------------------------------

if __name__ == "__main__":
    key = jax.random.PRNGKey(0)
    k_pix, k_state, k_act, k_param = jax.random.split(key, 4)

    batch, n_drones = 2, 2
    H, W = 96, 128            # spatial size hard-coded in the module's fc math
    state_dim, action_dim, hidden_dim = 10, 4, 64

    pixel = jax.random.normal(k_pix, (batch, n_drones, H, W), jnp.float32)
    state = jax.random.normal(k_state, (batch, n_drones, state_dim), jnp.float32)
    a = jax.random.normal(k_act, (batch, n_drones, action_dim), jnp.float32)

    params = init_critic_params(k_param, state_dim, action_dim, hidden_dim)
    fused = prepare_fused_fc(params)

    q1, q2 = critic_forward(params, fused, pixel, state, a)
    q1 = jax.block_until_ready(q1)
    q2 = jax.block_until_ready(q2)

    q1_ref, q2_ref = critic_forward_ref(params, pixel, state, a)
    assert q1.shape == (batch, n_drones, 1) and q2.shape == (batch, n_drones, 1)
    assert jnp.allclose(q1, q1_ref, rtol=2e-2, atol=2e-2)
    assert jnp.allclose(q2, q2_ref, rtol=2e-2, atol=2e-2)

    print("KERNEL_OK")
</pallas_src>

<mosaic_0001>
module attributes {stable_mosaic.version = 11 : i64} {
  func.func @_conv_gemm_kernel(%arg0: i32, %arg1: memref<8x64xf32, #tpu.memory_space<vmem>>, %arg2: memref<64x2944xf32, #tpu.memory_space<vmem>>, %arg3: memref<8x1xf32, #tpu.memory_space<vmem>>, %arg4: memref<8x2944xf32, #tpu.memory_space<vmem>>) attributes {dimension_semantics = [#tpu.dimension_semantics<parallel>], iteration_bounds = array<i64: 1>, scalar_prefetch = 0 : i64, scratch_operands = 0 : i64, tpu.core_type = #tpu.core_type<tc>, window_params = [{pipeline_mode = #tpu.pipeline_mode<synchronous>, transform_indices = @transform_0, window_bounds = array<i64: 8, 64>}, {transform_indices = @transform_1, window_bounds = array<i64: 64, 2944>}, {pipeline_mode = #tpu.pipeline_mode<synchronous>, transform_indices = @transform_2, window_bounds = array<i64: 8, 1>}, {transform_indices = @transform_3, window_bounds = array<i64: 8, 2944>}]} {
    %c0 = arith.constant 0 : index
    %c0_0 = arith.constant 0 : index
    %0 = vector.load %arg1[%c0, %c0_0] : memref<8x64xf32, #tpu.memory_space<vmem>>, vector<8x64xf32>
    %c0_1 = arith.constant 0 : index
    %c0_2 = arith.constant 0 : index
    %1 = vector.load %arg2[%c0_1, %c0_2] : memref<64x2944xf32, #tpu.memory_space<vmem>>, vector<64x2944xf32>
    %cst = arith.constant dense<0.000000e+00> : vector<8x2944xf32>
    %2 = tpu.matmul %0, %1, %cst {dimension_numbers = #tpu.dot_dimension_numbers<[1], [0], [0], [1], [0, 0, 1, 1], [], []>} : vector<8x64xf32>, vector<64x2944xf32>, vector<8x2944xf32> -> vector<8x2944xf32>
    %c0_3 = arith.constant 0 : index
    %c0_4 = arith.constant 0 : index
    %3 = vector.load %arg3[%c0_3, %c0_4] : memref<8x1xf32, #tpu.memory_space<vmem>>, vector<8x1xf32>
    %4 = vector.broadcast %3 : vector<8x1xf32> to vector<8x2944xf32>
    %5 = arith.addf %2, %4 : vector<8x2944xf32>
    %cst_5 = arith.constant 0.000000e+00 : f32
    %6 = vector.broadcast %cst_5 : f32 to vector<8x2944xf32>
    %7 = arith.maximumf %5, %6 : vector<8x2944xf32>
    %c0_6 = arith.constant 0 : index
    %c0_7 = arith.constant 0 : index
    %8 = vector.load %arg4[%c0_6, %c0_7] : memref<8x2944xf32, #tpu.memory_space<vmem>>, vector<8x2944xf32>
    tpu.vector_store %arg4[%c0_6, %c0_7], %7 {strides = array<i32>} : memref<8x2944xf32, #tpu.memory_space<vmem>>, vector<8x2944xf32>,
    return
  }
  func.func @transform_0(%arg0: i32) -> (i32, i32) {
    %c0_i32 = arith.constant 0 : i32
    %c0_i32_0 = arith.constant 0 : i32
    %c0_i32_1 = arith.constant 0 : i32
    return %c0_i32, %c0_i32_0 : i32, i32
  }
  func.func @transform_1(%arg0: i32) -> (i32, i32) {
    %c0_i32 = arith.constant 0 : i32
    %c0_i32_0 = arith.constant 0 : i32
    return %c0_i32, %arg0 : i32, i32
  }
  func.func @transform_2(%arg0: i32) -> (i32, i32) {
    %c0_i32 = arith.constant 0 : i32
    %c0_i32_0 = arith.constant 0 : i32
    %c0_i32_1 = arith.constant 0 : i32
    return %c0_i32, %c0_i32_0 : i32, i32
  }
  func.func @transform_3(%arg0: i32) -> (i32, i32) {
    %c0_i32 = arith.constant 0 : i32
    %c0_i32_0 = arith.constant 0 : i32
    return %c0_i32, %arg0 : i32, i32
  }
}

module attributes {stable_mosaic.version = 11 : i64} {
  func.func @_conv_gemm_kernel(%arg0: i32, %arg1: memref<8x128xf32, #tpu.memory_space<vmem>>, %arg2: memref<128x640xf32, #tpu.memory_space<vmem>>, %arg3: memref<8x1xf32, #tpu.memory_space<vmem>>, %arg4: memref<8x640xf32, #tpu.memory_space<vmem>>) attributes {dimension_semantics = [#tpu.dimension_semantics<parallel>], iteration_bounds = array<i64: 1>, scalar_prefetch = 0 : i64, scratch_operands = 0 : i64, tpu.core_type = #tpu.core_type<tc>, window_params = [{pipeline_mode = #tpu.pipeline_mode<synchronous>, transform_indices = @transform_0, window_bounds = array<i64: 8, 128>}, {transform_indices = @transform_1, window_bounds = array<i64: 128, 640>}, {pipeline_mode = #tpu.pipeline_mode<synchronous>, transform_indices = @transform_2, window_bounds = array<i64: 8, 1>}, {transform_indices = @transform_3, window_bounds = array<i64: 8, 640>}]} {
    %c0 = arith.constant 0 : index
    %c0_0 = arith.constant 0 : index
    %0 = vector.load %arg1[%c0, %c0_0] : memref<8x128xf32, #tpu.memory_space<vmem>>, vector<8x128xf32>
    %c0_1 = arith.constant 0 : index
    %c0_2 = arith.constant 0 : index
    %1 = vector.load %arg2[%c0_1, %c0_2] : memref<128x640xf32, #tpu.memory_space<vmem>>, vector<128x640xf32>
    %cst = arith.constant dense<0.000000e+00> : vector<8x640xf32>
    %2 = tpu.matmul %0, %1, %cst {dimension_numbers = #tpu.dot_dimension_numbers<[1], [0], [0], [1], [0, 0, 1, 1], [], []>} : vector<8x128xf32>, vector<128x640xf32>, vector<8x640xf32> -> vector<8x640xf32>
    %c0_3 = arith.constant 0 : index
    %c0_4 = arith.constant 0 : index
    %3 = vector.load %arg3[%c0_3, %c0_4] : memref<8x1xf32, #tpu.memory_space<vmem>>, vector<8x1xf32>
    %4 = vector.broadcast %3 : vector<8x1xf32> to vector<8x640xf32>
    %5 = arith.addf %2, %4 : vector<8x640xf32>
    %cst_5 = arith.constant 0.000000e+00 : f32
    %6 = vector.broadcast %cst_5 : f32 to vector<8x640xf32>
    %7 = arith.maximumf %5, %6 : vector<8x640xf32>
    %c0_6 = arith.constant 0 : index
    %c0_7 = arith.constant 0 : index
    %8 = vector.load %arg4[%c0_6, %c0_7] : memref<8x640xf32, #tpu.memory_space<vmem>>, vector<8x640xf32>
    tpu.vector_store %arg4[%c0_6, %c0_7], %7 {strides = array<i32>} : memref<8x640xf32, #tpu.memory_space<vmem>>, vector<8x640xf32>,
    return
  }
  func.func @transform_0(%arg0: i32) -> (i32, i32) {
    %c0_i32 = arith.constant 0 : i32
    %c0_i32_0 = arith.constant 0 : i32
    %c0_i32_1 = arith.constant 0 : i32
    return %c0_i32, %c0_i32_0 : i32, i32
  }
  func.func @transform_1(%arg0: i32) -> (i32, i32) {
    %c0_i32 = arith.constant 0 : i32
    %c0_i32_0 = arith.constant 0 : i32
    return %c0_i32, %arg0 : i32, i32
  }
  func.func @transform_2(%arg0: i32) -> (i32, i32) {
    %c0_i32 = arith.constant 0 : i32
    %c0_i32_0 = arith.constant 0 : i32
    %c0_i32_1 = arith.constant 0 : i32
    return %c0_i32, %c0_i32_0 : i32, i32
  }
  func.func @transform_3(%arg0: i32) -> (i32, i32) {
    %c0_i32 = arith.constant 0 : i32
    %c0_i32_0 = arith.constant 0 : i32
    return %c0_i32, %arg0 : i32, i32
  }
}

module attributes {stable_mosaic.version = 11 : i64} {
  func.func @_conv_gemm_kernel(%arg0: i32, %arg1: memref<8x72xf32, #tpu.memory_space<vmem>>, %arg2: memref<72x384xf32, #tpu.memory_space<vmem>>, %arg3: memref<8x1xf32, #tpu.memory_space<vmem>>, %arg4: memref<8x384xf32, #tpu.memory_space<vmem>>) attributes {dimension_semantics = [#tpu.dimension_semantics<parallel>], iteration_bounds = array<i64: 1>, scalar_prefetch = 0 : i64, scratch_operands = 0 : i64, tpu.core_type = #tpu.core_type<tc>, window_params = [{pipeline_mode = #tpu.pipeline_mode<synchronous>, transform_indices = @transform_0, window_bounds = array<i64: 8, 72>}, {transform_indices = @transform_1, window_bounds = array<i64: 72, 384>}, {pipeline_mode = #tpu.pipeline_mode<synchronous>, transform_indices = @transform_2, window_bounds = array<i64: 8, 1>}, {transform_indices = @transform_3, window_bounds = array<i64: 8, 384>}]} {
    %c0 = arith.constant 0 : index
    %c0_0 = arith.constant 0 : index
    %0 = vector.load %arg1[%c0, %c0_0] : memref<8x72xf32, #tpu.memory_space<vmem>>, vector<8x72xf32>
    %c0_1 = arith.constant 0 : index
    %c0_2 = arith.constant 0 : index
    %1 = vector.load %arg2[%c0_1, %c0_2] : memref<72x384xf32, #tpu.memory_space<vmem>>, vector<72x384xf32>
    %cst = arith.constant dense<0.000000e+00> : vector<8x384xf32>
    %2 = tpu.matmul %0, %1, %cst {dimension_numbers = #tpu.dot_dimension_numbers<[1], [0], [0], [1], [0, 0, 1, 1], [], []>} : vector<8x72xf32>, vector<72x384xf32>, vector<8x384xf32> -> vector<8x384xf32>
    %c0_3 = arith.constant 0 : index
    %c0_4 = arith.constant 0 : index
    %3 = vector.load %arg3[%c0_3, %c0_4] : memref<8x1xf32, #tpu.memory_space<vmem>>, vector<8x1xf32>
    %4 = vector.broadcast %3 : vector<8x1xf32> to vector<8x384xf32>
    %5 = arith.addf %2, %4 : vector<8x384xf32>
    %cst_5 = arith.constant 0.000000e+00 : f32
    %6 = vector.broadcast %cst_5 : f32 to vector<8x384xf32>
    %7 = arith.maximumf %5, %6 : vector<8x384xf32>
    %c0_6 = arith.constant 0 : index
    %c0_7 = arith.constant 0 : index
    %8 = vector.load %arg4[%c0_6, %c0_7] : memref<8x384xf32, #tpu.memory_space<vmem>>, vector<8x384xf32>
    tpu.vector_store %arg4[%c0_6, %c0_7], %7 {strides = array<i32>} : memref<8x384xf32, #tpu.memory_space<vmem>>, vector<8x384xf32>,
    return
  }
  func.func @transform_0(%arg0: i32) -> (i32, i32) {
    %c0_i32 = arith.constant 0 : i32
    %c0_i32_0 = arith.constant 0 : i32
    %c0_i32_1 = arith.constant 0 : i32
    return %c0_i32, %c0_i32_0 : i32, i32
  }
  func.func @transform_1(%arg0: i32) -> (i32, i32) {
    %c0_i32 = arith.constant 0 : i32
    %c0_i32_0 = arith.constant 0 : i32
    return %c0_i32, %arg0 : i32, i32
  }
  func.func @transform_2(%arg0: i32) -> (i32, i32) {
    %c0_i32 = arith.constant 0 : i32
    %c0_i32_0 = arith.constant 0 : i32
    %c0_i32_1 = arith.constant 0 : i32
    return %c0_i32, %c0_i32_0 : i32, i32
  }
  func.func @transform_3(%arg0: i32) -> (i32, i32) {
    %c0_i32 = arith.constant 0 : i32
    %c0_i32_0 = arith.constant 0 : i32
    return %c0_i32, %arg0 : i32, i32
  }
}

module attributes {stable_mosaic.version = 11 : i64} {
  func.func @_fc_twin_kernel(%arg0: i32, %arg1: memref<8x896xf32, #tpu.memory_space<vmem>>, %arg2: memref<896x128xf32, #tpu.memory_space<vmem>>, %arg3: memref<1x128xf32, #tpu.memory_space<vmem>>, %arg4: memref<128x128xf32, #tpu.memory_space<vmem>>, %arg5: memref<1x128xf32, #tpu.memory_space<vmem>>, %arg6: memref<128x128xf32, #tpu.memory_space<vmem>>, %arg7: memref<1x128xf32, #tpu.memory_space<vmem>>, %arg8: memref<8x128xf32, #tpu.memory_space<vmem>>) attributes {dimension_semantics = [#tpu.dimension_semantics<parallel>], iteration_bounds = array<i64: 1>, scalar_prefetch = 0 : i64, scratch_operands = 0 : i64, tpu.core_type = #tpu.core_type<tc>, window_params = [{transform_indices = @transform_0, window_bounds = array<i64: 8, 896>}, {pipeline_mode = #tpu.pipeline_mode<synchronous>, transform_indices = @transform_1, window_bounds = array<i64: 896, 128>}, {pipeline_mode = #tpu.pipeline_mode<synchronous>, transform_indices = @transform_2, window_bounds = array<i64: 1, 128>}, {pipeline_mode = #tpu.pipeline_mode<synchronous>, transform_indices = @transform_3, window_bounds = array<i64: 128, 128>}, {pipeline_mode = #tpu.pipeline_mode<synchronous>, transform_indices = @transform_4, window_bounds = array<i64: 1, 128>}, {pipeline_mode = #tpu.pipeline_mode<synchronous>, transform_indices = @transform_5, window_bounds = array<i64: 128, 128>}, {pipeline_mode = #tpu.pipeline_mode<synchronous>, transform_indices = @transform_6, window_bounds = array<i64: 1, 128>}, {transform_indices = @transform_7, window_bounds = array<i64: 8, 128>}]} {
    %c0 = arith.constant 0 : index
    %c0_0 = arith.constant 0 : index
    %0 = vector.load %arg1[%c0, %c0_0] : memref<8x896xf32, #tpu.memory_space<vmem>>, vector<8x896xf32>
    %c0_1 = arith.constant 0 : index
    %c0_2 = arith.constant 0 : index
    %1 = vector.load %arg2[%c0_1, %c0_2] : memref<896x128xf32, #tpu.memory_space<vmem>>, vector<896x128xf32>
    %cst = arith.constant dense<0.000000e+00> : vector<8x128xf32>
    %2 = tpu.matmul %0, %1, %cst {dimension_numbers = #tpu.dot_dimension_numbers<[1], [0], [0], [1], [0, 0, 1, 1], [], []>} : vector<8x896xf32>, vector<896x128xf32>, vector<8x128xf32> -> vector<8x128xf32>
    %c0_3 = arith.constant 0 : index
    %c0_4 = arith.constant 0 : index
    %3 = vector.load %arg3[%c0_3, %c0_4] : memref<1x128xf32, #tpu.memory_space<vmem>>, vector<1x128xf32>
    %4 = vector.broadcast %3 : vector<1x128xf32> to vector<8x128xf32>
    %5 = arith.addf %2, %4 : vector<8x128xf32>
    %cst_5 = arith.constant 0.000000e+00 : f32
    %6 = vector.broadcast %cst_5 : f32 to vector<8x128xf32>
    %7 = arith.maximumf %5, %6 : vector<8x128xf32>
    %c0_6 = arith.constant 0 : index
    %c0_7 = arith.constant 0 : index
    %8 = vector.load %arg4[%c0_6, %c0_7] : memref<128x128xf32, #tpu.memory_space<vmem>>, vector<128x128xf32>
    %cst_8 = arith.constant dense<0.000000e+00> : vector<8x128xf32>
    %9 = tpu.matmul %7, %8, %cst_8 {dimension_numbers = #tpu.dot_dimension_numbers<[1], [0], [0], [1], [0, 0, 1, 1], [], []>} : vector<8x128xf32>, vector<128x128xf32>, vector<8x128xf32> -> vector<8x128xf32>
    %c0_9 = arith.constant 0 : index
    %c0_10 = arith.constant 0 : index
    %10 = vector.load %arg5[%c0_9, %c0_10] : memref<1x128xf32, #tpu.memory_space<vmem>>, vector<1x128xf32>
    %11 = vector.broadcast %10 : vector<1x128xf32> to vector<8x128xf32>
    %12 = arith.addf %9, %11 : vector<8x128xf32>
    %cst_11 = arith.constant 0.000000e+00 : f32
    %13 = vector.broadcast %cst_11 : f32 to vector<8x128xf32>
    %14 = arith.maximumf %12, %13 : vector<8x128xf32>
    %c0_12 = arith.constant 0 : index
    %c0_13 = arith.constant 0 : index
    %15 = vector.load %arg6[%c0_12, %c0_13] : memref<128x128xf32, #tpu.memory_space<vmem>>, vector<128x128xf32>
    %cst_14 = arith.constant dense<0.000000e+00> : vector<8x128xf32>
    %16 = tpu.matmul %14, %15, %cst_14 {dimension_numbers = #tpu.dot_dimension_numbers<[1], [0], [0], [1], [0, 0, 1, 1], [], []>} : vector<8x128xf32>, vector<128x128xf32>, vector<8x128xf32> -> vector<8x128xf32>
    %c0_15 = arith.constant 0 : index
    %c0_16 = arith.constant 0 : index
    %17 = vector.load %arg7[%c0_15, %c0_16] : memref<1x128xf32, #tpu.memory_space<vmem>>, vector<1x128xf32>
    %18 = vector.broadcast %17 : vector<1x128xf32> to vector<8x128xf32>
    %19 = arith.addf %16, %18 : vector<8x128xf32>
    %c0_17 = arith.constant 0 : index
    %c0_18 = arith.constant 0 : index
    %20 = vector.load %arg8[%c0_17, %c0_18] : memref<8x128xf32, #tpu.memory_space<vmem>>, vector<8x128xf32>
    tpu.vector_store %arg8[%c0_17, %c0_18], %19 {strides = array<i32>} : memref<8x128xf32, #tpu.memory_space<vmem>>, vector<8x128xf32>,
    return
  }
  func.func @transform_0(%arg0: i32) -> (i32, i32) {
    %c0_i32 = arith.constant 0 : i32
    %c0_i32_0 = arith.constant 0 : i32
    return %arg0, %c0_i32 : i32, i32
  }
  func.func @transform_1(%arg0: i32) -> (i32, i32) {
    %c0_i32 = arith.constant 0 : i32
    %c0_i32_0 = arith.constant 0 : i32
    %c0_i32_1 = arith.constant 0 : i32
    return %c0_i32, %c0_i32_0 : i32, i32
  }
  func.func @transform_2(%arg0: i32) -> (i32, i32) {
    %c0_i32 = arith.constant 0 : i32
    %c0_i32_0 = arith.constant 0 : i32
    %c0_i32_1 = arith.constant 0 : i32
    return %c0_i32, %c0_i32_0 : i32, i32
  }
  func.func @transform_3(%arg0: i32) -> (i32, i32) {
    %c0_i32 = arith.constant 0 : i32
    %c0_i32_0 = arith.constant 0 : i32
    %c0_i32_1 = arith.constant 0 : i32
    return %c0_i32, %c0_i32_0 : i32, i32
  }
  func.func @transform_4(%arg0: i32) -> (i32, i32) {
    %c0_i32 = arith.constant 0 : i32
    %c0_i32_0 = arith.constant 0 : i32
    %c0_i32_1 = arith.constant 0 : i32
    return %c0_i32, %c0_i32_0 : i32, i32
  }
  func.func @transform_5(%arg0: i32) -> (i32, i32) {
    %c0_i32 = arith.constant 0 : i32
    %c0_i32_0 = arith.constant 0 : i32
    %c0_i32_1 = arith.constant 0 : i32
    return %c0_i32, %c0_i32_0 : i32, i32
  }
  func.func @transform_6(%arg0: i32) -> (i32, i32) {
    %c0_i32 = arith.constant 0 : i32
    %c0_i32_0 = arith.constant 0 : i32
    %c0_i32_1 = arith.constant 0 : i32
    return %c0_i32, %c0_i32_0 : i32, i32
  }
  func.func @transform_7(%arg0: i32) -> (i32, i32) {
    %c0_i32 = arith.constant 0 : i32
    %c0_i32_0 = arith.constant 0 : i32
    return %arg0, %c0_i32 : i32, i32
  }
}

</mosaic_0001>

<bundles_post_ra>
// kernel: _critic_forward.4
= control target key start
LH: loop header
LB: loop body
LE: loop exit
PB: predicated region body
PF: predicated region fallthrough
CT: control target
= control target key end

     0   :  { %v1343_v3 = vmov 0.0   ;;  %v1344_v8 = vmov 0   ;;  %vm205_vm0 = vcmask 523264   ;;  %vm1346_vm1 = vmmov 0   ;;  %s2057_s1 = inlined_call_operand.vmem [shape: f32[64,2944], index: 1, kind: input, shape index: {}]   ;;  %s2058_s0 = inlined_call_operand.vmem [shape: f32[8,64], index: 0, kind: input, shape index: {}]   ;;  %s2059_s2 = inlined_call_operand.vmem [shape: f32[8,1], index: 2, kind: input, shape index: {}]   ;;  %s2060_s3 = inlined_call_operand.vmem [shape: f32[8,2944], index: 3, kind: output, shape index: {}]  }
   0x1   :  { %v16_v0 = vld [vmem:[%s2057_s1 + $0x8] sm:$0xff]  ;;  %v39_v1 = vld [vmem:[%s2057_s1 + $0xc0] sm:$0xff]  ;;  %v18_v2 = vld [vmem:[%s2057_s1 + $0x18] sm:$0xff]  ;;  %273 = vmatprep.mubr.f32.mxu0 %v1343_v3  ;;  %344 = vmatprep.mubr.f32.mxu1 %v1343_v3 }
   0x2   :  { %v1150_v4 = vpack.c.bf16 %v39_v1, %v16_v0  ;;  %v41_v5 = vld [vmem:[%s2057_s1 + $0xd0] sm:$0xff]  ;;  %v15_v6 = vld [vmem:[%s2057_s1] sm:$0xff]  ;;  %v38_v7 = vld [vmem:[%s2057_s1 + $0xb8] sm:$0xff]  ;;  %1342 = vset.pattern.permute.xlu0 %v1344_v8 }
   0x3   :  { %v1166_v9 = vpack.c.bf16 %v41_v5, %v18_v2  ;;  %v1152_v10 = vpack.c.bf16 %v38_v7, %v15_v6  ;;  %v17_v11 = vld [vmem:[%s2057_s1 + $0x10] sm:$0xff]  ;;  %v40_v12 = vld [vmem:[%s2057_s1 + $0xc8] sm:$0xff]  ;;  %v62_v13 = vld [vmem:[%s2057_s1 + $0x178] sm:$0xff] }
   0x4   :  { %1151 = vmatprep.subr.bf16.mxu0 %v1150_v4  ;;  %v1168_v14 = vpack.c.bf16 %v40_v12, %v17_v11  ;;  %v85_v15 = vld [vmem:[%s2057_s1 + $0x230] sm:$0xff]  ;;  %v64_v16 = vld [vmem:[%s2057_s1 + $0x188] sm:$0xff]  ;;  %v87_v17 = vld [vmem:[%s2057_s1 + $0x240] sm:$0xff] }
   0x5   :  { %1167 = vmatprep.subr.bf16.mxu1 %v1166_v9  ;;  %1153 = vmatpush1.bf16.msra.mxu0 %v1152_v10  ;;  %v1154_v18 = vpack.c.bf16 %v85_v15, %v62_v13  ;;  %v1170_v19 = vpack.c.bf16 %v87_v17, %v64_v16  ;;  %v61_v20 = vld [vmem:[%s2057_s1 + $0x170] sm:$0xff]  ;;  %v84_v21 = vld [vmem:[%s2057_s1 + $0x228] sm:$0xff]  ;;  %v63_v22 = vld [vmem:[%s2057_s1 + $0x180] sm:$0xff] }
   0x6   :  { %1169 = vmatpush1.bf16.msra.mxu1 %v1168_v14  ;;  %v1156_v23 = vpack.c.bf16 %v84_v21, %v61_v20  ;;  %v86_v24 = vld [vmem:[%s2057_s1 + $0x238] sm:$0xff]  ;;  %v108_v25 = vld [vmem:[%s2057_s1 + $0x2e8] sm:$0xff]  ;;  %v131_v26 = vld [vmem:[%s2057_s1 + $0x3a0] sm:$0xff] }
   0x7   :  { %1155 = vmatprep.subr.bf16.mxu0 %v1154_v18  ;;  %1171 = vmatprep.subr.bf16.mxu1 %v1170_v19  ;;  %v1172_v27 = vpack.c.bf16 %v86_v24, %v63_v22  ;;  %v1158_v28 = vpack.c.bf16 %v131_v26, %v108_v25  ;;  %v110_v29 = vld [vmem:[%s2057_s1 + $0x2f8] sm:$0xff]  ;;  %v133_v30 = vld [vmem:[%s2057_s1 + $0x3b0] sm:$0xff]  ;;  %v107_v31 = vld [vmem:[%s2057_s1 + $0x2e0] sm:$0xff] }
   0x8   :  { %v1174_v32 = vpack.c.bf16 %v133_v30, %v110_v29  ;;  %v130_v33 = vld [vmem:[%s2057_s1 + $0x398] sm:$0xff]  ;;  %v109_v34 = vld [vmem:[%s2057_s1 + $0x2f0] sm:$0xff]  ;;  %v132_v35 = vld [vmem:[%s2057_s1 + $0x3a8] sm:$0xff] }
   0x9   :  { %1157 = vmatpush1.bf16.msra.mxu0 %v1156_v23  ;;  %v1160_v36 = vpack.c.bf16 %v130_v33, %v107_v31  ;;  %v154_v37 = vld [vmem:[%s2057_s1 + $0x458] sm:$0xff]  ;;  %v177_v38 = vld [vmem:[%s2057_s1 + $0x510] sm:$0xff]  ;;  %v156_v39 = vld [vmem:[%s2057_s1 + $0x468] sm:$0xff]  ;;  %v1176_v40 = vpack.c.bf16 %v132_v35, %v109_v34 }
   0xa   :  { %1173 = vmatpush1.bf16.msra.mxu1 %v1172_v27  ;;  %1159 = vmatprep.subr.bf16.mxu0 %v1158_v28  ;;  %v1162_v41 = vpack.c.bf16 %v177_v38, %v154_v37  ;;  %v179_v42 = vld [vmem:[%s2057_s1 + $0x520] sm:$0xff]  ;;  %v153_v43 = vld [vmem:[%s2057_s1 + $0x450] sm:$0xff]  ;;  %v176_v44 = vld [vmem:[%s2057_s1 + $0x508] sm:$0xff] }
   0xb   :  { %1175 = vmatprep.subr.bf16.mxu1 %v1174_v32  ;;  %v1178_v45 = vpack.c.bf16 %v179_v42, %v156_v39  ;;  %v155_v46 = vld [vmem:[%s2057_s1 + $0x460] sm:$0xff]  ;;  %v178_v47 = vld [vmem:[%s2057_s1 + $0x518] sm:$0xff]  ;;  %v20_v48 = vld [vmem:[%s2057_s1 + $0x28] sm:$0xff]  ;;  %v1164_v51 = vpack.c.bf16 %v176_v44, %v153_v43 }
   0xc   :  { %v43_v49 = vld [vmem:[%s2057_s1 + $0xe0] sm:$0xff]  ;;  %v22_v50 = vld [vmem:[%s2057_s1 + $0x38] sm:$0xff]  ;;  %v45_v52 = vld [vmem:[%s2057_s1 + $0xf0] sm:$0xff]  ;;  %v1180_v53 = vpack.c.bf16 %v178_v47, %v155_v46 }
   0xd   :  { %1161 = vmatpush1.bf16.msra.mxu0 %v1160_v36  ;;  %v1182_v54 = vpack.c.bf16 %v43_v49, %v20_v48  ;;  %v19_v55 = vld [vmem:[%s2057_s1 + $0x20] sm:$0xff]  ;;  %v42_v56 = vld [vmem:[%s2057_s1 + $0xd8] sm:$0xff]  ;;  %v21_v57 = vld [vmem:[%s2057_s1 + $0x30] sm:$0xff]  ;;  %v1198_v58 = vpack.c.bf16 %v45_v52, %v22_v50 }
   0xe   :  { %1177 = vmatpush1.bf16.msra.mxu1 %v1176_v40  ;;  %1163 = vmatprep.subr.bf16.mxu0 %v1162_v41  ;;  %v44_v59 = vld [vmem:[%s2057_s1 + $0xe8] sm:$0xff]  ;;  %v66_v60 = vld [vmem:[%s2057_s1 + $0x198] sm:$0xff]  ;;  %v89_v61 = vld [vmem:[%s2057_s1 + $0x250] sm:$0xff]  ;;  %v1184_v1 = vpack.c.bf16 %v42_v56, %v19_v55 }
   0xf   :  { %1179 = vmatprep.subr.bf16.mxu1 %v1178_v45  ;;  %v68_v62 = vld [vmem:[%s2057_s1 + $0x1a8] sm:$0xff]  ;;  %v91_v63 = vld [vmem:[%s2057_s1 + $0x260] sm:$0xff]  ;;  %v1200_v2 = vpack.c.bf16 %v44_v59, %v21_v57  ;;  %v1186_v4 = vpack.c.bf16 %v89_v61, %v66_v60  ;;  %v65_v5 = vld [vmem:[%s2057_s1 + $0x190] sm:$0xff] }
  0x10   :  { %v1504_v0 = vld [vmem:[%s2058_s0] sm:$0xff]  ;;  %v88_v6 = vld [vmem:[%s2057_s1 + $0x248] sm:$0xff]  ;;  %v1202_v8 = vpack.c.bf16 %v91_v63, %v68_v62  ;;  %v90_v9 = vld [vmem:[%s2057_s1 + $0x258] sm:$0xff] }
  0x11   :  { %1165 = vmatpush1.bf16.msra.mxu0 %v1164_v51  ;;  %v67_v7 = vld [vmem:[%s2057_s1 + $0x1a0] sm:$0xff]  ;;  %v112_v10 = vld [vmem:[%s2057_s1 + $0x308] sm:$0xff]  ;;  %v114_v12 = vld [vmem:[%s2057_s1 + $0x318] sm:$0xff]  ;;  %v1188_v14 = vpack.c.bf16 %v88_v6, %v65_v5 }
  0x12   :  { %1181 = vmatpush1.bf16.msra.mxu1 %v1180_v53  ;;  %1183 = vmatprep.subr.bf16.mxu0 %v1182_v54  ;;  %v135_v11 = vld [vmem:[%s2057_s1 + $0x3c0] sm:$0xff]  ;;  %v137_v13 = vld [vmem:[%s2057_s1 + $0x3d0] sm:$0xff]  ;;  %v1204_v15 = vpack.c.bf16 %v90_v9, %v67_v7  ;;  %v134_v18 = vld [vmem:[%s2057_s1 + $0x3b8] sm:$0xff] }
  0x13   :  { %1199 = vmatprep.subr.bf16.mxu1 %v1198_v58  ;;  %v1190_v16 = vpack.c.bf16 %v135_v11, %v112_v10  ;;  %v111_v17 = vld [vmem:[%s2057_s1 + $0x300] sm:$0xff]  ;;  %v113_v19 = vld [vmem:[%s2057_s1 + $0x310] sm:$0xff]  ;;  %v1206_v20 = vpack.c.bf16 %v137_v13, %v114_v12  ;;  %v136_v21 = vld [vmem:[%s2057_s1 + $0x3c8] sm:$0xff] }
  0x14   :  { %1110 = vmatmul.mubr.msk.f32.vlgmr.msra.gmra.mrb[0].mxu0 %vm205_vm0, %v1504_v0  ;;  %v158_v22 = vld [vmem:[%s2057_s1 + $0x478] sm:$0xff]  ;;  %v181_v23 = vld [vmem:[%s2057_s1 + $0x530] sm:$0xff]  ;;  %v160_v24 = vld [vmem:[%s2057_s1 + $0x488] sm:$0xff]  ;;  %v1192_v26 = vpack.c.bf16 %v134_v18, %v111_v17  ;;  %v1208_v27 = vpack.c.bf16 %v136_v21, %v113_v19 }
  0x15   :  { %1111 = vmatmul.mubr.msk.f32.vlgmr.msra.gmra.mrb[0].mxu1 %vm205_vm0, %v1504_v0  ;;  %1185 = vmatpush1.bf16.msra.mxu0 %v1184_v1  ;;  %v183_v25 = vld [vmem:[%s2057_s1 + $0x540] sm:$0xff]  ;;  %v1194_v28 = vpack.c.bf16 %v181_v23, %v158_v22  ;;  %v157_v29 = vld [vmem:[%s2057_s1 + $0x470] sm:$0xff]  ;;  %v180_v30 = vld [vmem:[%s2057_s1 + $0x528] sm:$0xff] }
  0x16   :  { %1201 = vmatpush1.bf16.msra.mxu1 %v1200_v2  ;;  %1187 = vmatprep.subr.bf16.mxu0 %v1186_v4  ;;  %v159_v31 = vld [vmem:[%s2057_s1 + $0x480] sm:$0xff]  ;;  %v1210_v32 = vpack.c.bf16 %v183_v25, %v160_v24  ;;  %v182_v33 = vld [vmem:[%s2057_s1 + $0x538] sm:$0xff]  ;;  %v24_v34 = vld [vmem:[%s2057_s1 + $0x48] sm:$0xff]  ;;  %v1196_v38 = vpack.c.bf16 %v180_v30, %v157_v29 }
  0x17   :  { %1203 = vmatprep.subr.bf16.mxu1 %v1202_v8  ;;  %415 = vmatprep.mubr.f32.mxu0 %v1343_v3  ;;  %v47_v35 = vld [vmem:[%s2057_s1 + $0x100] sm:$0xff]  ;;  %v26_v36 = vld [vmem:[%s2057_s1 + $0x58] sm:$0xff]  ;;  %v49_v37 = vld [vmem:[%s2057_s1 + $0x110] sm:$0xff]  ;;  %v1212_v39 = vpack.c.bf16 %v182_v33, %v159_v31 }
  0x18   :  { %486 = vmatprep.mubr.f32.mxu1 %v1343_v3  ;;  %v1214_v40 = vpack.c.bf16 %v47_v35, %v24_v34  ;;  %v23_v41 = vld [vmem:[%s2057_s1 + $0x40] sm:$0xff]  ;;  %v46_v42 = vld [vmem:[%s2057_s1 + $0xf8] sm:$0xff]  ;;  %v25_v43 = vld [vmem:[%s2057_s1 + $0x50] sm:$0xff]  ;;  %v1230_v44 = vpack.c.bf16 %v49_v37, %v26_v36 }
  0x19   :  { %1189 = vmatpush1.bf16.msra.mxu0 %v1188_v14  ;;  %v48_v45 = vld [vmem:[%s2057_s1 + $0x108] sm:$0xff]  ;;  %v70_v46 = vld [vmem:[%s2057_s1 + $0x1b8] sm:$0xff]  ;;  %v93_v47 = vld [vmem:[%s2057_s1 + $0x270] sm:$0xff]  ;;  %v1216_v50 = vpack.c.bf16 %v46_v42, %v23_v41 }
  0x1a   :  { %1205 = vmatpush1.bf16.msra.mxu1 %v1204_v15  ;;  %1191 = vmatprep.subr.bf16.mxu0 %v1190_v16  ;;  %v72_v48 = vld [vmem:[%s2057_s1 + $0x1c8] sm:$0xff]  ;;  %v95_v49 = vld [vmem:[%s2057_s1 + $0x280] sm:$0xff]  ;;  %v1232_v51 = vpack.c.bf16 %v48_v45, %v25_v43  ;;  %v1218_v52 = vpack.c.bf16 %v93_v47, %v70_v46  ;;  %v69_v53 = vld [vmem:[%s2057_s1 + $0x1b0] sm:$0xff] }
  0x1b   :  { %1207 = vmatprep.subr.bf16.mxu1 %v1206_v20  ;;  %v92_v54 = vld [vmem:[%s2057_s1 + $0x268] sm:$0xff]  ;;  %v71_v55 = vld [vmem:[%s2057_s1 + $0x1c0] sm:$0xff]  ;;  %v1234_v56 = vpack.c.bf16 %v95_v49, %v72_v48  ;;  %v94_v57 = vld [vmem:[%s2057_s1 + $0x278] sm:$0xff] }
  0x1c   :  { %v116_v58 = vld [vmem:[%s2057_s1 + $0x328] sm:$0xff]  ;;  %v139_v59 = vld [vmem:[%s2057_s1 + $0x3e0] sm:$0xff]  ;;  %v118_v60 = vld [vmem:[%s2057_s1 + $0x338] sm:$0xff]  ;;  %v1220_v62 = vpack.c.bf16 %v92_v54, %v69_v53  ;;  %v1236_v63 = vpack.c.bf16 %v94_v57, %v71_v55 }
  0x1d   :  { %1193 = vmatpush1.bf16.msra.mxu0 %v1192_v26  ;;  %v141_v61 = vld [vmem:[%s2057_s1 + $0x3f0] sm:$0xff]  ;;  %v1222_v1 = vpack.c.bf16 %v139_v59, %v116_v58  ;;  %v115_v2 = vld [vmem:[%s2057_s1 + $0x320] sm:$0xff]  ;;  %v138_v4 = vld [vmem:[%s2057_s1 + $0x3d8] sm:$0xff] }
  0x1e   :  { %1209 = vmatpush1.bf16.msra.mxu1 %v1208_v27  ;;  %1195 = vmatprep.subr.bf16.mxu0 %v1194_v28  ;;  %v117_v5 = vld [vmem:[%s2057_s1 + $0x330] sm:$0xff]  ;;  %v1238_v6 = vpack.c.bf16 %v141_v61, %v118_v60  ;;  %v140_v7 = vld [vmem:[%s2057_s1 + $0x3e8] sm:$0xff]  ;;  %v162_v8 = vld [vmem:[%s2057_s1 + $0x498] sm:$0xff]  ;;  %v1224_v12 = vpack.c.bf16 %v138_v4, %v115_v2 }
  0x1f   :  { %1211 = vmatprep.subr.bf16.mxu1 %v1210_v32  ;;  %v185_v9 = vld [vmem:[%s2057_s1 + $0x550] sm:$0xff]  ;;  %v164_v10 = vld [vmem:[%s2057_s1 + $0x4a8] sm:$0xff]  ;;  %v187_v11 = vld [vmem:[%s2057_s1 + $0x560] sm:$0xff]  ;;  %v1240_v13 = vpack.c.bf16 %v140_v7, %v117_v5 }
  0x20   :  { %v1226_v14 = vpack.c.bf16 %v185_v9, %v162_v8  ;;  %v161_v15 = vld [vmem:[%s2057_s1 + $0x490] sm:$0xff]  ;;  %v184_v16 = vld [vmem:[%s2057_s1 + $0x548] sm:$0xff]  ;;  %v163_v17 = vld [vmem:[%s2057_s1 + $0x4a0] sm:$0xff]  ;;  %v1242_v18 = vpack.c.bf16 %v187_v11, %v164_v10 }
  0x21   :  { %1197 = vmatpush1.bf16.msra.mxu0 %v1196_v38  ;;  %v186_v19 = vld [vmem:[%s2057_s1 + $0x558] sm:$0xff]  ;;  %v28_v20 = vld [vmem:[%s2057_s1 + $0x68] sm:$0xff]  ;;  %v51_v21 = vld [vmem:[%s2057_s1 + $0x120] sm:$0xff]  ;;  %v1228_v24 = vpack.c.bf16 %v184_v16, %v161_v15 }
  0x22   :  { %1213 = vmatpush1.bf16.msra.mxu1 %v1212_v39  ;;  %1215 = vmatprep.subr.bf16.mxu0 %v1214_v40  ;;  %v30_v22 = vld [vmem:[%s2057_s1 + $0x78] sm:$0xff]  ;;  %v53_v23 = vld [vmem:[%s2057_s1 + $0x130] sm:$0xff]  ;;  %v1244_v25 = vpack.c.bf16 %v186_v19, %v163_v17  ;;  %v1246_v26 = vpack.c.bf16 %v51_v21, %v28_v20  ;;  %v27_v27 = vld [vmem:[%s2057_s1 + $0x60] sm:$0xff] }
  0x23   :  { %1231 = vmatprep.subr.bf16.mxu1 %v1230_v44  ;;  %v50_v28 = vld [vmem:[%s2057_s1 + $0x118] sm:$0xff]  ;;  %v29_v29 = vld [vmem:[%s2057_s1 + $0x70] sm:$0xff]  ;;  %v1262_v30 = vpack.c.bf16 %v53_v23, %v30_v22  ;;  %v52_v31 = vld [vmem:[%s2057_s1 + $0x128] sm:$0xff] }
  0x24   :  { %1112 = vmatmul.mubr.msk.f32.vlgmr.msra.gmra.mrb[2].mxu0 %vm205_vm0, %v1504_v0  ;;  %v74_v32 = vld [vmem:[%s2057_s1 + $0x1d8] sm:$0xff]  ;;  %v97_v33 = vld [vmem:[%s2057_s1 + $0x290] sm:$0xff]  ;;  %v76_v34 = vld [vmem:[%s2057_s1 + $0x1e8] sm:$0xff]  ;;  %v1248_v36 = vpack.c.bf16 %v50_v28, %v27_v27  ;;  %v1264_v37 = vpack.c.bf16 %v52_v31, %v29_v29 }
  0x25   :  { %1113 = vmatmul.mubr.msk.f32.vlgmr.msra.gmra.mrb[2].mxu1 %vm205_vm0, %v1504_v0  ;;  %1217 = vmatpush1.bf16.msra.mxu0 %v1216_v50  ;;  %v99_v35 = vld [vmem:[%s2057_s1 + $0x2a0] sm:$0xff]  ;;  %v1250_v38 = vpack.c.bf16 %v97_v33, %v74_v32  ;;  %v73_v39 = vld [vmem:[%s2057_s1 + $0x1d0] sm:$0xff]  ;;  %v96_v40 = vld [vmem:[%s2057_s1 + $0x288] sm:$0xff] }
  0x26   :  { %1233 = vmatpush1.bf16.msra.mxu1 %v1232_v51  ;;  %1219 = vmatprep.subr.bf16.mxu0 %v1218_v52  ;;  %v75_v41 = vld [vmem:[%s2057_s1 + $0x1e0] sm:$0xff]  ;;  %v1266_v42 = vpack.c.bf16 %v99_v35, %v76_v34  ;;  %v98_v43 = vld [vmem:[%s2057_s1 + $0x298] sm:$0xff]  ;;  %v120_v44 = vld [vmem:[%s2057_s1 + $0x348] sm:$0xff]  ;;  %v1252_v48 = vpack.c.bf16 %v96_v40, %v73_v39 }
  0x27   :  { %1235 = vmatprep.subr.bf16.mxu1 %v1234_v56  ;;  %557 = vmatprep.mubr.f32.mxu0 %v1343_v3  ;;  %v143_v45 = vld [vmem:[%s2057_s1 + $0x400] sm:$0xff]  ;;  %v122_v46 = vld [vmem:[%s2057_s1 + $0x358] sm:$0xff]  ;;  %v145_v47 = vld [vmem:[%s2057_s1 + $0x410] sm:$0xff]  ;;  %v1268_v49 = vpack.c.bf16 %v98_v43, %v75_v41 }
  0x28   :  { %628 = vmatprep.mubr.f32.mxu1 %v1343_v3  ;;  %v1254_v50 = vpack.c.bf16 %v143_v45, %v120_v44  ;;  %v119_v51 = vld [vmem:[%s2057_s1 + $0x340] sm:$0xff]  ;;  %v142_v52 = vld [vmem:[%s2057_s1 + $0x3f8] sm:$0xff]  ;;  %v121_v53 = vld [vmem:[%s2057_s1 + $0x350] sm:$0xff]  ;;  %v1270_v54 = vpack.c.bf16 %v145_v47, %v122_v46 }
  0x29   :  { %1221 = vmatpush1.bf16.msra.mxu0 %v1220_v62  ;;  %v144_v55 = vld [vmem:[%s2057_s1 + $0x408] sm:$0xff]  ;;  %v166_v56 = vld [vmem:[%s2057_s1 + $0x4b8] sm:$0xff]  ;;  %v189_v57 = vld [vmem:[%s2057_s1 + $0x570] sm:$0xff]  ;;  %v1256_v60 = vpack.c.bf16 %v142_v52, %v119_v51 }
  0x2a   :  { %1237 = vmatpush1.bf16.msra.mxu1 %v1236_v63  ;;  %1223 = vmatprep.subr.bf16.mxu0 %v1222_v1  ;;  %v168_v58 = vld [vmem:[%s2057_s1 + $0x4c8] sm:$0xff]  ;;  %v191_v59 = vld [vmem:[%s2057_s1 + $0x580] sm:$0xff]  ;;  %v1272_v61 = vpack.c.bf16 %v144_v55, %v121_v53  ;;  %v1258_v62 = vpack.c.bf16 %v189_v57, %v166_v56  ;;  %v165_v63 = vld [vmem:[%s2057_s1 + $0x4b0] sm:$0xff] }
  0x2b   :  { %1239 = vmatprep.subr.bf16.mxu1 %v1238_v6  ;;  %v188_v1 = vld [vmem:[%s2057_s1 + $0x568] sm:$0xff]  ;;  %v167_v2 = vld [vmem:[%s2057_s1 + $0x4c0] sm:$0xff]  ;;  %v1274_v4 = vpack.c.bf16 %v191_v59, %v168_v58  ;;  %v190_v5 = vld [vmem:[%s2057_s1 + $0x578] sm:$0xff] }
  0x2c   :  { %v32_v6 = vld [vmem:[%s2057_s1 + $0x88] sm:$0xff]  ;;  %v55_v7 = vld [vmem:[%s2057_s1 + $0x140] sm:$0xff]  ;;  %v34_v8 = vld [vmem:[%s2057_s1 + $0x98] sm:$0xff]  ;;  %v1260_v10 = vpack.c.bf16 %v188_v1, %v165_v63 }
  0x2d   :  { %1225 = vmatpush1.bf16.msra.mxu0 %v1224_v12  ;;  %v57_v9 = vld [vmem:[%s2057_s1 + $0x150] sm:$0xff]  ;;  %v31_v11 = vld [vmem:[%s2057_s1 + $0x80] sm:$0xff]  ;;  %v1276_v12 = vpack.c.bf16 %v190_v5, %v167_v2  ;;  %v78_v19 = vld [vmem:[%s2057_s1 + $0x1f8] sm:$0xff] }
  0x2e   :  { %1241 = vmatpush1.bf16.msra.mxu1 %v1240_v13  ;;  %1227 = vmatprep.subr.bf16.mxu0 %v1226_v14  ;;  %v1278_v13 = vpack.c.bf16 %v55_v7, %v32_v6  ;;  %v54_v14 = vld [vmem:[%s2057_s1 + $0x138] sm:$0xff]  ;;  %v33_v15 = vld [vmem:[%s2057_s1 + $0x90] sm:$0xff]  ;;  %v199_v16 = vld [vmem:[%s2059_s2] sm:$0xff]  ;;  %v1294_v17 = vpack.c.bf16 %v57_v9, %v34_v8 }
  0x2f   :  { %1243 = vmatprep.subr.bf16.mxu1 %v1242_v18  ;;  %v56_v18 = vld [vmem:[%s2057_s1 + $0x148] sm:$0xff]  ;;  %v101_v20 = vld [vmem:[%s2057_s1 + $0x2b0] sm:$0xff]  ;;  %202 = vperm.xlu0 %1342, %v199_v16   ;;  %v103_v22 = vld [vmem:[%s2057_s1 + $0x2c0] sm:$0xff]  ;;  %v1280_v23 = vpack.c.bf16 %v54_v14, %v31_v11 }
  0x30   :  { %v80_v21 = vld [vmem:[%s2057_s1 + $0x208] sm:$0xff]  ;;  %v79_v28 = vld [vmem:[%s2057_s1 + $0x200] sm:$0xff]  ;;  %v126_v33 = vld [vmem:[%s2057_s1 + $0x378] sm:$0xff] }
  0x31   :  { %1229 = vmatpush1.bf16.msra.mxu0 %v1228_v24  ;;  %v1296_v24 = vpack.c.bf16 %v56_v18, %v33_v15  ;;  %v100_v27 = vld [vmem:[%s2057_s1 + $0x2a8] sm:$0xff]  ;;  %v1298_v29 = vpack.c.bf16 %v103_v22, %v80_v21  ;;  %v147_v32 = vld [vmem:[%s2057_s1 + $0x420] sm:$0xff]  ;;  %v149_v34 = vld [vmem:[%s2057_s1 + $0x430] sm:$0xff] }
  0x32   :  { %1245 = vmatpush1.bf16.msra.mxu1 %v1244_v25  ;;  %1247 = vmatprep.subr.bf16.mxu0 %v1246_v26  ;;  %v1282_v25 = vpack.c.bf16 %v101_v20, %v78_v19  ;;  %v77_v26 = vld [vmem:[%s2057_s1 + $0x1f0] sm:$0xff]  ;;  %v124_v31 = vld [vmem:[%s2057_s1 + $0x368] sm:$0xff]  ;;  %v146_v39 = vld [vmem:[%s2057_s1 + $0x418] sm:$0xff]  ;;  %v1302_v41 = vpack.c.bf16 %v149_v34, %v126_v33 }
  0x33   :  { %1263 = vmatprep.subr.bf16.mxu1 %v1262_v30  ;;  %v102_v30 = vld [vmem:[%s2057_s1 + $0x2b8] sm:$0xff]  ;;  %v1284_v35 = vpack.c.bf16 %v100_v27, %v77_v26  ;;  %v125_v40 = vld [vmem:[%s2057_s1 + $0x370] sm:$0xff]  ;;  %v172_v45 = vld [vmem:[%s2057_s1 + $0x4e8] sm:$0xff] }
  0x34   :  { %1114 = vmatmul.mubr.msk.f32.vlgmr.msra.gmra.mrb[4].mxu0 %vm205_vm0, %v1504_v0  ;;  %v170_v43 = vld [vmem:[%s2057_s1 + $0x4d8] sm:$0xff]  ;;  %v193_v44 = vld [vmem:[%s2057_s1 + $0x590] sm:$0xff]  ;;  %v195_v46 = vld [vmem:[%s2057_s1 + $0x5a0] sm:$0xff] }
  0x35   :  { %1115 = vmatmul.mubr.msk.f32.vlgmr.msra.gmra.mrb[4].mxu1 %vm205_vm0, %v1504_v0  ;;  %1249 = vmatpush1.bf16.msra.mxu0 %v1248_v36  ;;  %v1300_v36 = vpack.c.bf16 %v102_v30, %v79_v28  ;;  %v192_v51 = vld [vmem:[%s2057_s1 + $0x588] sm:$0xff]  ;;  %v171_v52 = vld [vmem:[%s2057_s1 + $0x4e0] sm:$0xff]  ;;  %v1306_v53 = vpack.c.bf16 %v195_v46, %v172_v45  ;;  %v82_v1 = vld [vmem:[%s2057_s1 + $0x218] sm:$0xff] }
  0x36   :  { %1265 = vmatpush1.bf16.msra.mxu1 %v1264_v37  ;;  %1251 = vmatprep.subr.bf16.mxu0 %v1250_v38  ;;  %v1286_v37 = vpack.c.bf16 %v147_v32, %v124_v31  ;;  %v123_v38 = vld [vmem:[%s2057_s1 + $0x360] sm:$0xff]  ;;  %v36_v55 = vld [vmem:[%s2057_s1 + $0xa8] sm:$0xff]  ;;  %v105_v2 = vld [vmem:[%s2057_s1 + $0x2d0] sm:$0xff] }
  0x37   :  { %1267 = vmatprep.subr.bf16.mxu1 %v1266_v42  ;;  %699 = vmatprep.mubr.f32.mxu0 %v1343_v3  ;;  %v148_v42 = vld [vmem:[%s2057_s1 + $0x428] sm:$0xff]  ;;  %v1288_v47 = vpack.c.bf16 %v146_v39, %v123_v38  ;;  %v59_v56 = vld [vmem:[%s2057_s1 + $0x160] sm:$0xff]  ;;  %v1314_v6 = vpack.c.bf16 %v105_v2, %v82_v1  ;;  %v81_v7 = vld [vmem:[%s2057_s1 + $0x210] sm:$0xff] }
  0x38   :  { %770 = vmatprep.mubr.f32.mxu1 %v1343_v3  ;;  %v1310_v59 = vpack.c.bf16 %v59_v56, %v36_v55  ;;  %v60_v63 = vld [vmem:[%s2057_s1 + $0x168] sm:$0xff]  ;;  %v83_v9 = vld [vmem:[%s2057_s1 + $0x220] sm:$0xff]  ;;  %v106_v11 = vld [vmem:[%s2057_s1 + $0x2d8] sm:$0xff] }
  0x39   :  { %1253 = vmatpush1.bf16.msra.mxu0 %v1252_v48  ;;  %v1304_v48 = vpack.c.bf16 %v148_v42, %v125_v40  ;;  %v104_v8 = vld [vmem:[%s2057_s1 + $0x2c8] sm:$0xff]  ;;  %v1330_v15 = vpack.c.bf16 %v106_v11, %v83_v9  ;;  %v150_v18 = vld [vmem:[%s2057_s1 + $0x438] sm:$0xff]  ;;  %v129_v19 = vld [vmem:[%s2057_s1 + $0x390] sm:$0xff] }
  0x3a   :  { %1269 = vmatpush1.bf16.msra.mxu1 %v1268_v49  ;;  %1255 = vmatprep.subr.bf16.mxu0 %v1254_v50  ;;  %v1290_v49 = vpack.c.bf16 %v193_v44, %v170_v43  ;;  %v169_v50 = vld [vmem:[%s2057_s1 + $0x4d0] sm:$0xff]  ;;  %v1316_v14 = vpack.c.bf16 %v104_v8, %v81_v7  ;;  %v152_v20 = vld [vmem:[%s2057_s1 + $0x448] sm:$0xff]  ;;  %v174_v21 = vld [vmem:[%s2057_s1 + $0x4f8] sm:$0xff] }
  0x3b   :  { %1271 = vmatprep.subr.bf16.mxu1 %v1270_v54  ;;  %v194_v54 = vld [vmem:[%s2057_s1 + $0x598] sm:$0xff]  ;;  %v1292_v57 = vpack.c.bf16 %v192_v51, %v169_v50  ;;  %v197_v22 = vld [vmem:[%s2057_s1 + $0x5b0] sm:$0xff]  ;;  %v196_v27 = vld [vmem:[%s2057_s1 + $0x5a8] sm:$0xff] }
  0x3c   :  { %v1308_v58 = vpack.c.bf16 %v194_v54, %v171_v52  ;;  %v173_v26 = vld [vmem:[%s2057_s1 + $0x4f0] sm:$0xff]  ;;  %v175_v28 = vld [vmem:[%s2057_s1 + $0x500] sm:$0xff] }
  0x3d   :  { %1257 = vmatpush1.bf16.msra.mxu0 %v1256_v60  ;;  %v35_v60 = vld [vmem:[%s2057_s1 + $0xa0] sm:$0xff] }
  0x3e   :  { %1273 = vmatpush1.bf16.msra.mxu1 %v1272_v61  ;;  %1259 = vmatprep.subr.bf16.mxu0 %v1258_v62  ;;  %v58_v61 = vld [vmem:[%s2057_s1 + $0x158] sm:$0xff]  ;;  %v37_v62 = vld [vmem:[%s2057_s1 + $0xb0] sm:$0xff] }
  0x3f   :  { %1275 = vmatprep.subr.bf16.mxu1 %v1274_v4  ;;  %v1312_v4 = vpack.c.bf16 %v58_v61, %v35_v60  ;;  %v1327_v5 = vpack.c.bf16 %v60_v63, %v37_v62 }
  0x41   :  { %1261 = vmatpush1.bf16.msra.mxu0 %v1260_v10  ;;  %v1345_v10 = vmov 0.0|0.0  }
  0x42   :  { %1277 = vmatpush1.bf16.msra.mxu1 %v1276_v12  ;;  %1279 = vmatprep.subr.bf16.mxu0 %v1278_v13  ;;  %v128_v12 = vld [vmem:[%s2057_s1 + $0x388] sm:$0xff]  ;;  %v151_v13 = vld [vmem:[%s2057_s1 + $0x440] sm:$0xff] }
  0x43   :  { %1295 = vmatprep.subr.bf16.mxu1 %v1294_v17  ;;  %v1318_v16 = vpack.c.bf16 %v151_v13, %v128_v12  ;;  %v127_v17 = vld [vmem:[%s2057_s1 + $0x380] sm:$0xff] }
  0x44   :  { %1116 = vmatmul.mubr.msk.f32.vlgmr.msra.gmra.mrb[6].mxu0 %vm205_vm0, %v1504_v0 }
  0x45   :  { %1117 = vmatmul.mubr.msk.f32.vlgmr.msra.gmra.mrb[6].mxu1 %vm205_vm0, %v1504_v0  ;;  %1281 = vmatpush1.bf16.msra.mxu0 %v1280_v23  ;;  %v1320_v23 = vpack.c.bf16 %v150_v18, %v127_v17 }
  0x46   :  { %1297 = vmatpush1.bf16.msra.mxu1 %v1296_v24  ;;  %1283 = vmatprep.subr.bf16.mxu0 %v1282_v25  ;;  %v1333_v24 = vpack.c.bf16 %v152_v20, %v129_v19  ;;  %v1322_v25 = vpack.c.bf16 %v197_v22, %v174_v21 }
  0x47   :  { %1299 = vmatprep.subr.bf16.mxu1 %v1298_v29  ;;  %841 = vmatprep.mubr.f32.mxu0 %v1343_v3  ;;  %v1324_v29 = vpack.c.bf16 %v196_v27, %v173_v26 }
  0x48   :  { %912 = vmatprep.mubr.f32.mxu1 %v1343_v3 }
  0x49   :  { %1285 = vmatpush1.bf16.msra.mxu0 %v1284_v35 }
  0x4a   :  { %1301 = vmatpush1.bf16.msra.mxu1 %v1300_v36  ;;  %1287 = vmatprep.subr.bf16.mxu0 %v1286_v37 }
  0x4b   :  { %1303 = vmatprep.subr.bf16.mxu1 %v1302_v41 }
  0x4d   :  { %1289 = vmatpush1.bf16.msra.mxu0 %v1288_v47 }
  0x4e   :  { %1305 = vmatpush1.bf16.msra.mxu1 %v1304_v48  ;;  %1291 = vmatprep.subr.bf16.mxu0 %v1290_v49 }
  0x4f   :  { %1307 = vmatprep.subr.bf16.mxu1 %v1306_v53 }
  0x51   :  { %1293 = vmatpush1.bf16.msra.mxu0 %v1292_v57 }
  0x52   :  { %1309 = vmatpush1.bf16.msra.mxu1 %v1308_v58  ;;  %1311 = vmatprep.subr.bf16.mxu0 %v1310_v59 }
  0x53   :  { %1326 = vmatprep.subr.bf16.mxu1 %v1345_v10 }
  0x54   :  { %1118 = vmatmul.mubr.msk.f32.vlgmr.msra.gmra.mrb[8].mxu0 %vm205_vm0, %v1504_v0 }
  0x55   :  { %1119 = vmatmul.mubr.msk.f32.vlgmr.msra.gmra.mrb[8].mxu1 %vm205_vm0, %v1504_v0  ;;  %1313 = vmatpush1.bf16.msra.mxu0 %v1312_v4 }
  0x56   :  { %1328 = vmatpush3.bf16.msra.mxu1 %v1327_v5  ;;  %1315 = vmatprep.subr.bf16.mxu0 %v1314_v6 }
  0x57   :  { %1329 = vmatprep.subr.bf16.mxu1 %v1345_v10  ;;  %983 = vmatprep.mubr.f32.mxu0 %v1343_v3 }
  0x58   :  { %1147 = vmatprep.mubr.msk.f32.mxu1 %vm1346_vm1, %v1343_v3  ;;  %v198_v3 = vld [vmem:[%s2057_s1 + $0x5b8] sm:$0xff] }
  0x59   :  { %1317 = vmatpush1.bf16.msra.mxu0 %v1316_v14  ;;  %v1336_v30 = vpack.c.bf16 %v198_v3, %v175_v28 }
  0x5a   :  { %1331 = vmatpush3.bf16.msra.mxu1 %v1330_v15  ;;  %1319 = vmatprep.subr.bf16.mxu0 %v1318_v16 }
  0x5b   :  { %1332 = vmatprep.subr.bf16.mxu1 %v1345_v10 }
  0x5d   :  { %1321 = vmatpush1.bf16.msra.mxu0 %v1320_v23 }
  0x5e   :  { %1334 = vmatpush3.bf16.msra.mxu1 %v1333_v24  ;;  %1323 = vmatprep.subr.bf16.mxu0 %v1322_v25 }
  0x5f   :  { %1335 = vmatprep.subr.bf16.mxu1 %v1345_v10 }
  0x61   :  { %1325 = vmatpush1.bf16.msra.mxu0 %v1324_v29 }
  0x62   :  { %1337 = vmatpush3.bf16.msra.mxu1 %v1336_v30 }
  0x64   :  { %1120 = vmatmul.mubr.msk.f32.vlgmr.msra.gmra.mrb[10].mxu0 %vm205_vm0, %v1504_v0 }
  0x65   :  { %1148 = vmatmul.mubr.msk.f32.vlgmr.msra.gmra.mrb[10].mxu1 %vm205_vm0, %v1504_v0 }
  0xae   :  { %v1963_v31 = vpop.permute.xlu0 %202 }
  0xe7   :  { %v275_v32 = vpop.f32.mrb[0].mxu0 }
  0xe8   :  { %v276_v33 = vadd.f32 %v275_v32, %v1963_v31  ;;  %v277_v34 = vpop.f32.mrb[1].mxu0  ;;  %v346_v35 = vpop.f32.mrb[0].mxu1 }
  0xe9   :  { %v278_v36 = vadd.f32 %v277_v34, %v1963_v31  ;;  %v347_v37 = vadd.f32 %v346_v35, %v1963_v31  ;;  %v348_v38 = vpop.f32.mrb[1].mxu1 }
  0xea   :  { %v1060_v39 = vmax.f32 %v276_v33, 0.0  ;;  %v349_v40 = vadd.f32 %v348_v38, %v1963_v31 }
  0xeb   :  { %v1061_v41 = vmax.f32 %v278_v36, 0.0  ;;  %v1062_v42 = vmax.f32 %v347_v37, 0.0 }
  0xec   :  { %1083 = vst [vmem:[%s2060_s3] sm:$0xff] %v1060_v39  ;;  %v1063_v0 = vmax.f32 %v349_v40, 0.0 }
  0xed   :  { %1084 = vst [vmem:[%s2060_s3 + $0x8] sm:$0xff] %v1061_v41  ;;  %1085 = vst [vmem:[%s2060_s3 + $0x10] sm:$0xff] %v1062_v42 }
  0xee   :  { %1086 = vst [vmem:[%s2060_s3 + $0x18] sm:$0xff] %v1063_v0 }
  0xf7   :  { %v417_v43 = vpop.f32.mrb[2].mxu0 }
  0xf8   :  { %v418_v44 = vadd.f32 %v417_v43, %v1963_v31  ;;  %v419_v45 = vpop.f32.mrb[3].mxu0  ;;  %v488_v46 = vpop.f32.mrb[2].mxu1 }
  0xf9   :  { %v420_v47 = vadd.f32 %v419_v45, %v1963_v31  ;;  %v489_v48 = vadd.f32 %v488_v46, %v1963_v31  ;;  %v490_v49 = vpop.f32.mrb[3].mxu1 }
  0xfa   :  { %v1064_v50 = vmax.f32 %v418_v44, 0.0  ;;  %v491_v51 = vadd.f32 %v490_v49, %v1963_v31 }
  0xfb   :  { %v1065_v52 = vmax.f32 %v420_v47, 0.0  ;;  %v1066_v53 = vmax.f32 %v489_v48, 0.0 }
  0xfc   :  { %1087 = vst [vmem:[%s2060_s3 + $0x20] sm:$0xff] %v1064_v50  ;;  %v1067_v54 = vmax.f32 %v491_v51, 0.0 }
  0xfd   :  { %1088 = vst [vmem:[%s2060_s3 + $0x28] sm:$0xff] %v1065_v52  ;;  %1089 = vst [vmem:[%s2060_s3 + $0x30] sm:$0xff] %v1066_v53 }
  0xfe   :  { %1090 = vst [vmem:[%s2060_s3 + $0x38] sm:$0xff] %v1067_v54 }
 0x107   :  { %v559_v55 = vpop.f32.mrb[4].mxu0 }
 0x108   :  { %v560_v56 = vadd.f32 %v559_v55, %v1963_v31  ;;  %v561_v57 = vpop.f32.mrb[5].mxu0  ;;  %v630_v58 = vpop.f32.mrb[4].mxu1 }
 0x109   :  { %v562_v59 = vadd.f32 %v561_v57, %v1963_v31  ;;  %v631_v60 = vadd.f32 %v630_v58, %v1963_v31  ;;  %v632_v61 = vpop.f32.mrb[5].mxu1 }
 0x10a   :  { %v1068_v62 = vmax.f32 %v560_v56, 0.0  ;;  %v633_v63 = vadd.f32 %v632_v61, %v1963_v31 }
 0x10b   :  { %v1069_v1 = vmax.f32 %v562_v59, 0.0  ;;  %v1070_v2 = vmax.f32 %v631_v60, 0.0 }
 0x10c   :  { %1091 = vst [vmem:[%s2060_s3 + $0x40] sm:$0xff] %v1068_v62  ;;  %v1071_v4 = vmax.f32 %v633_v63, 0.0 }
 0x10d   :  { %1092 = vst [vmem:[%s2060_s3 + $0x48] sm:$0xff] %v1069_v1  ;;  %1093 = vst [vmem:[%s2060_s3 + $0x50] sm:$0xff] %v1070_v2 }
 0x10e   :  { %1094 = vst [vmem:[%s2060_s3 + $0x58] sm:$0xff] %v1071_v4 }
 0x117   :  { %v701_v5 = vpop.f32.mrb[6].mxu0 }
 0x118   :  { %v702_v6 = vadd.f32 %v701_v5, %v1963_v31  ;;  %v703_v7 = vpop.f32.mrb[7].mxu0  ;;  %v772_v8 = vpop.f32.mrb[6].mxu1 }
 0x119   :  { %v704_v9 = vadd.f32 %v703_v7, %v1963_v31  ;;  %v773_v10 = vadd.f32 %v772_v8, %v1963_v31  ;;  %v774_v11 = vpop.f32.mrb[7].mxu1 }
 0x11a   :  { %v1072_v12 = vmax.f32 %v702_v6, 0.0  ;;  %v775_v13 = vadd.f32 %v774_v11, %v1963_v31 }
 0x11b   :  { %v1073_v14 = vmax.f32 %v704_v9, 0.0  ;;  %v1074_v15 = vmax.f32 %v773_v10, 0.0 }
 0x11c   :  { %1095 = vst [vmem:[%s2060_s3 + $0x60] sm:$0xff] %v1072_v12  ;;  %v1075_v16 = vmax.f32 %v775_v13, 0.0 }
 0x11d   :  { %1096 = vst [vmem:[%s2060_s3 + $0x68] sm:$0xff] %v1073_v14  ;;  %1097 = vst [vmem:[%s2060_s3 + $0x70] sm:$0xff] %v1074_v15 }
 0x11e   :  { %1098 = vst [vmem:[%s2060_s3 + $0x78] sm:$0xff] %v1075_v16 }
 0x127   :  { %v843_v17 = vpop.f32.mrb[8].mxu0 }
 0x128   :  { %v844_v18 = vadd.f32 %v843_v17, %v1963_v31  ;;  %v845_v19 = vpop.f32.mrb[9].mxu0  ;;  %v914_v20 = vpop.f32.mrb[8].mxu1 }
 0x129   :  { %v846_v21 = vadd.f32 %v845_v19, %v1963_v31  ;;  %v915_v22 = vadd.f32 %v914_v20, %v1963_v31  ;;  %v916_v23 = vpop.f32.mrb[9].mxu1 }
 0x12a   :  { %v1076_v24 = vmax.f32 %v844_v18, 0.0  ;;  %v917_v25 = vadd.f32 %v916_v23, %v1963_v31 }
 0x12b   :  { %v1077_v26 = vmax.f32 %v846_v21, 0.0  ;;  %v1078_v27 = vmax.f32 %v915_v22, 0.0 }
 0x12c   :  { %1099 = vst [vmem:[%s2060_s3 + $0x80] sm:$0xff] %v1076_v24  ;;  %v1079_v28 = vmax.f32 %v917_v25, 0.0 }
 0x12d   :  { %1100 = vst [vmem:[%s2060_s3 + $0x88] sm:$0xff] %v1077_v26  ;;  %1101 = vst [vmem:[%s2060_s3 + $0x90] sm:$0xff] %v1078_v27 }
 0x12e   :  { %1102 = vst [vmem:[%s2060_s3 + $0x98] sm:$0xff] %v1079_v28 }
 0x137   :  { %v985_v3 = vpop.f32.mrb[10].mxu0 }
 0x138   :  { %v986_v29 = vadd.f32 %v985_v3, %v1963_v31  ;;  %v1056_v30 = vpop.f32.mrb[10].mxu1  ;;  %v987_v32 = vpop.f32.mrb[11].mxu0 }
 0x139   :  { %v1057_v33 = vadd.f32 %v1056_v30, %v1963_v31  ;;  %v988_v34 = vadd.f32 %v987_v32, %v1963_v31  ;;  %v1149_v35 = vpop.f32.mrb[11].mxu1 }
 0x13a   :  { %v1080_v36 = vmax.f32 %v986_v29, 0.0 }
 0x13b   :  { %v1082_v37 = vmax.f32 %v1057_v33, 0.0  ;;  %v1081_v38 = vmax.f32 %v988_v34, 0.0 }
 0x13c   :  { %1103 = vst [vmem:[%s2060_s3 + $0xa0] sm:$0xff] %v1080_v36 }
 0x13d   :  { %1105 = vst [vmem:[%s2060_s3 + $0xb0] sm:$0xff] %v1082_v37  ;;  %1104 = vst [vmem:[%s2060_s3 + $0xa8] sm:$0xff] %v1081_v38 }

// kernel: _critic_forward.5
= control target key start
LH: loop header
LB: loop body
LE: loop exit
PB: predicated region body
PF: predicated region fallthrough
CT: control target
= control target key end

     0   :  { %v472_v3 = vmov 0.0   ;;  %v473_v8 = vmov 0   ;;  %vm475_vm0 = vmmov 0   ;;  %s760_s1 = inlined_call_operand.vmem [shape: f32[128,640], index: 1, kind: input, shape index: {}]   ;;  %s761_s2 = inlined_call_operand.vmem [shape: f32[8,1], index: 2, kind: input, shape index: {}]   ;;  %s762_s0 = inlined_call_operand.vmem [shape: f32[8,128], index: 0, kind: input, shape index: {}]   ;;  %s763_s3 = inlined_call_operand.vmem [shape: f32[8,640], index: 3, kind: output, shape index: {}]  }
   0x1   :  { %v16_v0 = vld [vmem:[%s760_s1 + $0x8] sm:$0xff]  ;;  %v21_v1 = vld [vmem:[%s760_s1 + $0x30] sm:$0xff]  ;;  %v15_v2 = vld [vmem:[%s760_s1] sm:$0xff]  ;;  %165 = vmatprep.mubr.f32.mxu0 %v472_v3  ;;  %236 = vmatprep.mubr.f32.mxu1 %v472_v3 }
   0x2   :  { %v379_v4 = vpack.c.bf16 %v21_v1, %v16_v0  ;;  %v20_v5 = vld [vmem:[%s760_s1 + $0x28] sm:$0xff]  ;;  %v26_v6 = vld [vmem:[%s760_s1 + $0x58] sm:$0xff]  ;;  %v31_v7 = vld [vmem:[%s760_s1 + $0x80] sm:$0xff]  ;;  %471 = vset.pattern.permute.xlu0 %v473_v8 }
   0x3   :  { %v381_v9 = vpack.c.bf16 %v20_v5, %v15_v2  ;;  %v383_v10 = vpack.c.bf16 %v31_v7, %v26_v6  ;;  %v25_v11 = vld [vmem:[%s760_s1 + $0x50] sm:$0xff]  ;;  %v30_v12 = vld [vmem:[%s760_s1 + $0x78] sm:$0xff]  ;;  %v36_v13 = vld [vmem:[%s760_s1 + $0xa8] sm:$0xff] }
   0x4   :  { %380 = vmatprep.subr.bf16.mxu0 %v379_v4  ;;  %v41_v14 = vld [vmem:[%s760_s1 + $0xd0] sm:$0xff]  ;;  %v385_v15 = vpack.c.bf16 %v30_v12, %v25_v11  ;;  %v35_v17 = vld [vmem:[%s760_s1 + $0xa0] sm:$0xff]  ;;  %v40_v18 = vld [vmem:[%s760_s1 + $0xc8] sm:$0xff] }
   0x5   :  { %382 = vmatpush1.bf16.msra.mxu0 %v381_v9  ;;  %v387_v16 = vpack.c.bf16 %v41_v14, %v36_v13  ;;  %v46_v19 = vld [vmem:[%s760_s1 + $0xf8] sm:$0xff]  ;;  %v51_v20 = vld [vmem:[%s760_s1 + $0x120] sm:$0xff]  ;;  %v389_v21 = vpack.c.bf16 %v40_v18, %v35_v17  ;;  %v45_v23 = vld [vmem:[%s760_s1 + $0xf0] sm:$0xff] }
   0x6   :  { %384 = vmatprep.subr.bf16.mxu0 %v383_v10  ;;  %v391_v22 = vpack.c.bf16 %v51_v20, %v46_v19  ;;  %v50_v24 = vld [vmem:[%s760_s1 + $0x118] sm:$0xff]  ;;  %v56_v25 = vld [vmem:[%s760_s1 + $0x148] sm:$0xff]  ;;  %v61_v26 = vld [vmem:[%s760_s1 + $0x170] sm:$0xff] }
   0x7   :  { %v18_v27 = vld [vmem:[%s760_s1 + $0x18] sm:$0xff]  ;;  %v23_v28 = vld [vmem:[%s760_s1 + $0x40] sm:$0xff]  ;;  %v17_v29 = vld [vmem:[%s760_s1 + $0x10] sm:$0xff]  ;;  %v393_v31 = vpack.c.bf16 %v50_v24, %v45_v23  ;;  %v395_v36 = vpack.c.bf16 %v61_v26, %v56_v25 }
   0x8   :  { %v22_v30 = vld [vmem:[%s760_s1 + $0x38] sm:$0xff]  ;;  %v55_v32 = vld [vmem:[%s760_s1 + $0x140] sm:$0xff]  ;;  %v60_v33 = vld [vmem:[%s760_s1 + $0x168] sm:$0xff]  ;;  %v411_v34 = vpack.c.bf16 %v23_v28, %v18_v27 }
   0x9   :  { %386 = vmatpush1.bf16.msra.mxu0 %v385_v15  ;;  %v413_v35 = vpack.c.bf16 %v22_v30, %v17_v29  ;;  %v28_v37 = vld [vmem:[%s760_s1 + $0x68] sm:$0xff]  ;;  %v33_v38 = vld [vmem:[%s760_s1 + $0x90] sm:$0xff]  ;;  %v27_v39 = vld [vmem:[%s760_s1 + $0x60] sm:$0xff]  ;;  %v397_v47 = vpack.c.bf16 %v60_v33, %v55_v32 }
   0xa   :  { %388 = vmatprep.subr.bf16.mxu0 %v387_v16  ;;  %v66_v40 = vld [vmem:[%s760_s1 + $0x198] sm:$0xff]  ;;  %v71_v41 = vld [vmem:[%s760_s1 + $0x1c0] sm:$0xff]  ;;  %412 = vmatprep.subr.bf16.mxu1 %v411_v34  ;;  %v415_v42 = vpack.c.bf16 %v33_v38, %v28_v37  ;;  %v32_v43 = vld [vmem:[%s760_s1 + $0x88] sm:$0xff]  ;;  %v474_v34 = vmov 0.0|0.0  }
   0xb   :  { %414 = vmatpush1.bf16.msra.mxu1 %v413_v35  ;;  %v417_v44 = vpack.c.bf16 %v32_v43, %v27_v39  ;;  %v38_v45 = vld [vmem:[%s760_s1 + $0xb8] sm:$0xff]  ;;  %v43_v46 = vld [vmem:[%s760_s1 + $0xe0] sm:$0xff]  ;;  %v65_v48 = vld [vmem:[%s760_s1 + $0x190] sm:$0xff]  ;;  %v399_v52 = vpack.c.bf16 %v71_v41, %v66_v40 }
   0xc   :  { %416 = vmatprep.subr.bf16.mxu1 %v415_v42  ;;  %v419_v49 = vpack.c.bf16 %v43_v46, %v38_v45  ;;  %v37_v50 = vld [vmem:[%s760_s1 + $0xb0] sm:$0xff]  ;;  %v42_v51 = vld [vmem:[%s760_s1 + $0xd8] sm:$0xff]  ;;  %v48_v54 = vld [vmem:[%s760_s1 + $0x108] sm:$0xff] }
   0xd   :  { %390 = vmatpush1.bf16.msra.mxu0 %v389_v21  ;;  %v70_v53 = vld [vmem:[%s760_s1 + $0x1b8] sm:$0xff]  ;;  %v53_v55 = vld [vmem:[%s760_s1 + $0x130] sm:$0xff]  ;;  %v76_v56 = vld [vmem:[%s760_s1 + $0x1e8] sm:$0xff]  ;;  %v421_v58 = vpack.c.bf16 %v42_v51, %v37_v50 }
   0xe   :  { %392 = vmatprep.subr.bf16.mxu0 %v391_v22  ;;  %v81_v57 = vld [vmem:[%s760_s1 + $0x210] sm:$0xff]  ;;  %v401_v59 = vpack.c.bf16 %v70_v53, %v65_v48  ;;  %v75_v60 = vld [vmem:[%s760_s1 + $0x1e0] sm:$0xff]  ;;  %v423_v61 = vpack.c.bf16 %v53_v55, %v48_v54  ;;  %v52_v63 = vld [vmem:[%s760_s1 + $0x128] sm:$0xff] }
   0xf   :  { %418 = vmatpush1.bf16.msra.mxu1 %v417_v44  ;;  %v47_v62 = vld [vmem:[%s760_s1 + $0x100] sm:$0xff]  ;;  %v403_v0 = vpack.c.bf16 %v81_v57, %v76_v56  ;;  %v80_v1 = vld [vmem:[%s760_s1 + $0x208] sm:$0xff]  ;;  %v58_v2 = vld [vmem:[%s760_s1 + $0x158] sm:$0xff] }
  0x10   :  { %420 = vmatprep.subr.bf16.mxu1 %v419_v49  ;;  %v63_v4 = vld [vmem:[%s760_s1 + $0x180] sm:$0xff]  ;;  %v86_v5 = vld [vmem:[%s760_s1 + $0x238] sm:$0xff]  ;;  %v425_v7 = vpack.c.bf16 %v52_v63, %v47_v62  ;;  %v405_v8 = vpack.c.bf16 %v80_v1, %v75_v60  ;;  %v85_v9 = vld [vmem:[%s760_s1 + $0x230] sm:$0xff] }
  0x11   :  { %394 = vmatpush1.bf16.msra.mxu0 %v393_v31  ;;  %v91_v6 = vld [vmem:[%s760_s1 + $0x260] sm:$0xff]  ;;  %v427_v10 = vpack.c.bf16 %v63_v4, %v58_v2  ;;  %v57_v11 = vld [vmem:[%s760_s1 + $0x150] sm:$0xff]  ;;  %v62_v12 = vld [vmem:[%s760_s1 + $0x178] sm:$0xff] }
  0x12   :  { %396 = vmatprep.subr.bf16.mxu0 %v395_v36  ;;  %v407_v13 = vpack.c.bf16 %v91_v6, %v86_v5  ;;  %v90_v14 = vld [vmem:[%s760_s1 + $0x258] sm:$0xff]  ;;  %v68_v15 = vld [vmem:[%s760_s1 + $0x1a8] sm:$0xff]  ;;  %v73_v16 = vld [vmem:[%s760_s1 + $0x1d0] sm:$0xff]  ;;  %v429_v17 = vpack.c.bf16 %v62_v12, %v57_v11 }
  0x13   :  { %422 = vmatpush1.bf16.msra.mxu1 %v421_v58  ;;  %v95_v18 = vld [vmem:[%s761_s2] sm:$0xff]  ;;  %v409_v19 = vpack.c.bf16 %v90_v14, %v85_v9  ;;  %v431_v21 = vpack.c.bf16 %v73_v16, %v68_v15  ;;  %v72_v23 = vld [vmem:[%s760_s1 + $0x1c8] sm:$0xff]  ;;  %v78_v25 = vld [vmem:[%s760_s1 + $0x1f8] sm:$0xff] }
  0x14   :  { %424 = vmatprep.subr.bf16.mxu1 %v423_v61  ;;  %v19_v20 = vld [vmem:[%s760_s1 + $0x20] sm:$0xff]  ;;  %v24_v24 = vld [vmem:[%s760_s1 + $0x48] sm:$0xff]  ;;  %98 = vperm.xlu0 %471, %v95_v18   ;;  %v29_v30 = vld [vmem:[%s760_s1 + $0x70] sm:$0xff] }
  0x15   :  { %398 = vmatpush1.bf16.msra.mxu0 %v397_v47  ;;  %v67_v22 = vld [vmem:[%s760_s1 + $0x1a0] sm:$0xff]  ;;  %v444_v29 = vpack.c.bf16 %v24_v24, %v19_v20  ;;  %v77_v32 = vld [vmem:[%s760_s1 + $0x1f0] sm:$0xff]  ;;  %v82_v33 = vld [vmem:[%s760_s1 + $0x218] sm:$0xff] }
  0x16   :  { %400 = vmatprep.subr.bf16.mxu0 %v399_v52  ;;  %v83_v26 = vld [vmem:[%s760_s1 + $0x220] sm:$0xff]  ;;  %v433_v28 = vpack.c.bf16 %v72_v23, %v67_v22  ;;  %v34_v35 = vld [vmem:[%s760_s1 + $0x98] sm:$0xff]  ;;  %v88_v36 = vld [vmem:[%s760_s1 + $0x248] sm:$0xff]  ;;  %v437_v38 = vpack.c.bf16 %v82_v33, %v77_v32 }
  0x17   :  { %426 = vmatpush1.bf16.msra.mxu1 %v425_v7  ;;  %v14_v27 = vld [vmem:[%s762_s0] sm:$0xff]  ;;  %v435_v31 = vpack.c.bf16 %v83_v26, %v78_v25  ;;  %v93_v37 = vld [vmem:[%s760_s1 + $0x270] sm:$0xff]  ;;  %v447_v39 = vpack.c.bf16 %v34_v35, %v29_v30  ;;  %v92_v42 = vld [vmem:[%s760_s1 + $0x268] sm:$0xff] }
  0x18   :  { %428 = vmatprep.subr.bf16.mxu1 %v427_v10  ;;  %v439_v40 = vpack.c.bf16 %v93_v37, %v88_v36  ;;  %v87_v41 = vld [vmem:[%s760_s1 + $0x240] sm:$0xff]  ;;  %v44_v44 = vld [vmem:[%s760_s1 + $0xe8] sm:$0xff]  ;;  %v49_v47 = vld [vmem:[%s760_s1 + $0x110] sm:$0xff] }
  0x19   :  { %402 = vmatpush1.bf16.msra.mxu0 %v401_v59  ;;  %v39_v43 = vld [vmem:[%s760_s1 + $0xc0] sm:$0xff]  ;;  %v441_v45 = vpack.c.bf16 %v92_v42, %v87_v41  ;;  %v54_v48 = vld [vmem:[%s760_s1 + $0x138] sm:$0xff]  ;;  %v64_v50 = vld [vmem:[%s760_s1 + $0x188] sm:$0xff] }
  0x1a   :  { %404 = vmatprep.subr.bf16.mxu0 %v403_v0  ;;  %v450_v46 = vpack.c.bf16 %v44_v44, %v39_v43  ;;  %v453_v49 = vpack.c.bf16 %v54_v48, %v49_v47  ;;  %v69_v52 = vld [vmem:[%s760_s1 + $0x1b0] sm:$0xff]  ;;  %v74_v53 = vld [vmem:[%s760_s1 + $0x1d8] sm:$0xff]  ;;  %v79_v55 = vld [vmem:[%s760_s1 + $0x200] sm:$0xff] }
  0x1b   :  { %430 = vmatpush1.bf16.msra.mxu1 %v429_v17  ;;  %v459_v54 = vpack.c.bf16 %v74_v53, %v69_v52  ;;  %v84_v56 = vld [vmem:[%s760_s1 + $0x228] sm:$0xff]  ;;  %v89_v58 = vld [vmem:[%s760_s1 + $0x250] sm:$0xff]  ;;  %v94_v59 = vld [vmem:[%s760_s1 + $0x278] sm:$0xff] }
  0x1c   :  { %432 = vmatprep.subr.bf16.mxu1 %v431_v21  ;;  %v462_v57 = vpack.c.bf16 %v84_v56, %v79_v55  ;;  %v465_v60 = vpack.c.bf16 %v94_v59, %v89_v58 }
  0x1d   :  { %406 = vmatpush1.bf16.msra.mxu0 %v405_v8 }
  0x1e   :  { %408 = vmatprep.subr.bf16.mxu0 %v407_v13 }
  0x1f   :  { %434 = vmatpush1.bf16.msra.mxu1 %v433_v28 }
  0x20   :  { %436 = vmatprep.subr.bf16.mxu1 %v435_v31 }
  0x21   :  { %410 = vmatpush1.bf16.msra.mxu0 %v409_v19 }
  0x22   :  { %443 = vmatprep.subr.bf16.mxu0 %v474_v34 }
  0x23   :  { %438 = vmatpush1.bf16.msra.mxu1 %v437_v38 }
  0x24   :  { %166 = vmatmul.mubr.f32.vlgmr.msra.gmra.mrb[0].mxu0 %v14_v27  ;;  %440 = vmatprep.subr.bf16.mxu1 %v439_v40 }
  0x25   :  { %445 = vmatpush3.bf16.msra.mxu0 %v444_v29  ;;  %376 = vmatprep.mubr.msk.f32.mxu0 %vm475_vm0, %v472_v3  ;;  %v59_v3 = vld [vmem:[%s760_s1 + $0x160] sm:$0xff] }
  0x26   :  { %446 = vmatprep.subr.bf16.mxu0 %v474_v34  ;;  %v456_v51 = vpack.c.bf16 %v64_v50, %v59_v3 }
  0x27   :  { %442 = vmatpush1.bf16.msra.mxu1 %v441_v45 }
  0x29   :  { %448 = vmatpush3.bf16.msra.mxu0 %v447_v39 }
  0x2a   :  { %449 = vmatprep.subr.bf16.mxu0 %v474_v34  ;;  %237 = vmatmul.mubr.f32.vlgmr.msra.gmra.mrb[0].mxu1 %v14_v27 }
  0x2d   :  { %451 = vmatpush3.bf16.msra.mxu0 %v450_v46 }
  0x2e   :  { %452 = vmatprep.subr.bf16.mxu0 %v474_v34 }
  0x31   :  { %454 = vmatpush3.bf16.msra.mxu0 %v453_v49 }
  0x32   :  { %455 = vmatprep.subr.bf16.mxu0 %v474_v34 }
  0x35   :  { %457 = vmatpush3.bf16.msra.mxu0 %v456_v51 }
  0x36   :  { %458 = vmatprep.subr.bf16.mxu0 %v474_v34 }
  0x39   :  { %460 = vmatpush3.bf16.msra.mxu0 %v459_v54 }
  0x3a   :  { %461 = vmatprep.subr.bf16.mxu0 %v474_v34 }
  0x3d   :  { %463 = vmatpush3.bf16.msra.mxu0 %v462_v57 }
  0x3e   :  { %464 = vmatprep.subr.bf16.mxu0 %v474_v34 }
  0x41   :  { %466 = vmatpush3.bf16.msra.mxu0 %v465_v60 }
  0x44   :  { %377 = vmatmul.mubr.f32.vlgmr.msra.gmra.mrb[2].mxu0 %v14_v27 }
  0x93   :  { %v99_v61 = vpop.permute.xlu0 %98 }
  0xf7   :  { %v167_v62 = vpop.f32.mrb[0].mxu0 }
  0xf8   :  { %v168_v63 = vadd.f32 %v167_v62, %v99_v61  ;;  %v169_v0 = vpop.f32.mrb[1].mxu0 }
  0xf9   :  { %v170_v1 = vadd.f32 %v169_v0, %v99_v61 }
  0xfa   :  { %v313_v2 = vmax.f32 %v168_v63, 0.0 }
  0xfb   :  { %v314_v4 = vmax.f32 %v170_v1, 0.0 }
  0xfc   :  { %318 = vst [vmem:[%s763_s3] sm:$0xff] %v313_v2 }
  0xfd   :  { %319 = vst [vmem:[%s763_s3 + $0x8] sm:$0xff] %v314_v4  ;;  %v238_v5 = vpop.f32.mrb[0].mxu1 }
  0xfe   :  { %v239_v6 = vadd.f32 %v238_v5, %v99_v61  ;;  %v240_v7 = vpop.f32.mrb[1].mxu1 }
  0xff   :  { %v241_v8 = vadd.f32 %v240_v7, %v99_v61 }
 0x100   :  { %v315_v9 = vmax.f32 %v239_v6, 0.0 }
 0x101   :  { %v316_v10 = vmax.f32 %v241_v8, 0.0 }
 0x102   :  { %320 = vst [vmem:[%s763_s3 + $0x10] sm:$0xff] %v315_v9 }
 0x103   :  { %321 = vst [vmem:[%s763_s3 + $0x18] sm:$0xff] %v316_v10 }
 0x117   :  { %v309_v11 = vpop.f32.mrb[2].mxu0 }
 0x118   :  { %v310_v12 = vadd.f32 %v309_v11, %v99_v61  ;;  %v378_v13 = vpop.f32.mrb[3].mxu0 }
 0x11a   :  { %v317_v14 = vmax.f32 %v310_v12, 0.0 }
 0x11c   :  { %322 = vst [vmem:[%s763_s3 + $0x20] sm:$0xff] %v317_v14 }

// kernel: _critic_forward.6
= control target key start
LH: loop header
LB: loop body
LE: loop exit
PB: predicated region body
PF: predicated region fallthrough
CT: control target
= control target key end

     0   :  { %v269_v2 = vmov 0.0|0.0   ;;  %v270_v4 = vmov 0.0   ;;  %vm271_vm0 = vmmov 0   ;;  %v272_v9 = vmov 0   ;;  %s389_s1 = inlined_call_operand.vmem [shape: f32[72,384], index: 1, kind: input, shape index: {}]   ;;  %s390_s2 = inlined_call_operand.vmem [shape: f32[8,1], index: 2, kind: input, shape index: {}]   ;;  %s391_s0 = inlined_call_operand.vmem [shape: f32[8,72], index: 0, kind: input, shape index: {}]   ;;  %s392_s3 = inlined_call_operand.vmem [shape: f32[8,384], index: 3, kind: output, shape index: {}]  }
   0x1   :  { %v16_v0 = vld [vmem:[%s389_s1 + $0x8] sm:$0xff]  ;;  %v19_v1 = vld [vmem:[%s389_s1 + $0x20] sm:$0xff]  ;;  %252 = vmatprep.subr.bf16.mxu1 %v269_v2  ;;  %116 = vmatprep.mubr.f32.mxu0 %v270_v4  ;;  %v18_v6 = vld [vmem:[%s389_s1 + $0x18] sm:$0xff]  ;;  %vm48_vm1 = vcmask 588800  }
   0x2   :  { %v15_v3 = vld [vmem:[%s389_s1] sm:$0xff]  ;;  %v236_v5 = vpack.c.bf16 %v19_v1, %v16_v0  ;;  %v17_v7 = vld [vmem:[%s389_s1 + $0x10] sm:$0xff]  ;;  %v20_v8 = vld [vmem:[%s389_s1 + $0x28] sm:$0xff]  ;;  %233 = vmatprep.mubr.msk.f32.mxu1 %vm271_vm0, %v270_v4  ;;  %268 = vset.pattern.permute.xlu0 %v272_v9 }
   0x3   :  { %v238_v10 = vpack.c.bf16 %v18_v6, %v15_v3  ;;  %v253_v11 = vpack.c.bf16 %v20_v8, %v17_v7  ;;  %v22_v12 = vld [vmem:[%s389_s1 + $0x38] sm:$0xff]  ;;  %v25_v13 = vld [vmem:[%s389_s1 + $0x50] sm:$0xff]  ;;  %v24_v16 = vld [vmem:[%s389_s1 + $0x48] sm:$0xff] }
   0x4   :  { %v21_v14 = vld [vmem:[%s389_s1 + $0x30] sm:$0xff]  ;;  %237 = vmatprep.subr.bf16.mxu0 %v236_v5  ;;  %v240_v15 = vpack.c.bf16 %v25_v13, %v22_v12  ;;  %v23_v17 = vld [vmem:[%s389_s1 + $0x40] sm:$0xff]  ;;  %v26_v18 = vld [vmem:[%s389_s1 + $0x58] sm:$0xff] }
   0x5   :  { %239 = vmatpush1.bf16.msra.mxu0 %v238_v10  ;;  %254 = vmatpush3.bf16.msra.mxu1 %v253_v11  ;;  %v242_v19 = vpack.c.bf16 %v24_v16, %v21_v14  ;;  %v256_v20 = vpack.c.bf16 %v26_v18, %v23_v17  ;;  %v28_v21 = vld [vmem:[%s389_s1 + $0x68] sm:$0xff]  ;;  %v31_v22 = vld [vmem:[%s389_s1 + $0x80] sm:$0xff]  ;;  %v30_v25 = vld [vmem:[%s389_s1 + $0x78] sm:$0xff] }
   0x6   :  { %v27_v23 = vld [vmem:[%s389_s1 + $0x60] sm:$0xff]  ;;  %241 = vmatprep.subr.bf16.mxu0 %v240_v15  ;;  %255 = vmatprep.subr.bf16.mxu1 %v269_v2  ;;  %v244_v24 = vpack.c.bf16 %v31_v22, %v28_v21  ;;  %v29_v26 = vld [vmem:[%s389_s1 + $0x70] sm:$0xff]  ;;  %v32_v27 = vld [vmem:[%s389_s1 + $0x88] sm:$0xff] }
   0x7   :  { %v34_v28 = vld [vmem:[%s389_s1 + $0x98] sm:$0xff]  ;;  %v37_v29 = vld [vmem:[%s389_s1 + $0xb0] sm:$0xff]  ;;  %v246_v30 = vpack.c.bf16 %v30_v25, %v27_v23  ;;  %v259_v31 = vpack.c.bf16 %v32_v27, %v29_v26  ;;  %v36_v33 = vld [vmem:[%s389_s1 + $0xa8] sm:$0xff] }
   0x8   :  { %v33_v32 = vld [vmem:[%s389_s1 + $0x90] sm:$0xff]  ;;  %v248_v34 = vpack.c.bf16 %v37_v29, %v34_v28  ;;  %v35_v35 = vld [vmem:[%s389_s1 + $0xa0] sm:$0xff]  ;;  %v38_v36 = vld [vmem:[%s389_s1 + $0xb8] sm:$0xff] }
   0x9   :  { %243 = vmatpush1.bf16.msra.mxu0 %v242_v19  ;;  %257 = vmatpush3.bf16.msra.mxu1 %v256_v20  ;;  %v42_v37 = vld [vmem:[%s390_s2] sm:$0xff]  ;;  %v250_v38 = vpack.c.bf16 %v36_v33, %v33_v32  ;;  %v262_v39 = vpack.c.bf16 %v38_v36, %v35_v35  ;;  %v40_v40 = vld [vmem:[%s389_s1 + $0xc8] sm:$0xff]  ;;  %v41_v42 = vld [vmem:[%s389_s1 + $0xd0] sm:$0xff] }
   0xa   :  { %245 = vmatprep.subr.bf16.mxu0 %v244_v24  ;;  %258 = vmatprep.subr.bf16.mxu1 %v269_v2  ;;  %v39_v41 = vld [vmem:[%s389_s1 + $0xc0] sm:$0xff] }
   0xb   :  { %45 = vperm.xlu0 %268, %v42_v37   ;;  %v14_v43 = vld [vmem:[%s391_s0] sm:$0xff] }
   0xd   :  { %247 = vmatpush1.bf16.msra.mxu0 %v246_v30  ;;  %260 = vmatpush3.bf16.msra.mxu1 %v259_v31 }
   0xe   :  { %249 = vmatprep.subr.bf16.mxu0 %v248_v34  ;;  %261 = vmatprep.subr.bf16.mxu1 %v269_v2 }
  0x11   :  { %251 = vmatpush1.bf16.msra.mxu0 %v250_v38  ;;  %263 = vmatpush3.bf16.msra.mxu1 %v262_v39 }
  0x12   :  { %68 = vmatprep.subr.mxu0 %v40_v40  ;;  %231 = vmatprep.subr.mxu1 %v270_v4 }
  0x15   :  { %69 = vmatpush1.msra.mxu0 %v39_v41  ;;  %232 = vmatpush3.msra.mxu1 %v41_v42 }
  0x16   :  { %203 = vmatmul.mubr.msk.f32.vlgmr.msra.gmra.mrb[0].mxu0 %vm48_vm1, %v14_v43  ;;  %234 = vmatmul.mubr.msk.f32.vlgmr.msra.gmra.mrb[0].mxu1 %vm48_vm1, %v14_v43 }
  0x8a   :  { %v46_v44 = vpop.permute.xlu0 %45 }
  0xe9   :  { %v118_v45 = vpop.f32.mrb[0].mxu0  ;;  %v189_v46 = vpop.f32.mrb[0].mxu1 }
  0xea   :  { %v119_v47 = vadd.f32 %v118_v45, %v46_v44  ;;  %v190_v48 = vadd.f32 %v189_v46, %v46_v44  ;;  %v120_v49 = vpop.f32.mrb[1].mxu0  ;;  %v235_v50 = vpop.f32.mrb[1].mxu1 }
  0xeb   :  { %v121_v51 = vadd.f32 %v120_v49, %v46_v44 }
  0xec   :  { %v193_v52 = vmax.f32 %v119_v47, 0.0  ;;  %v195_v53 = vmax.f32 %v190_v48, 0.0 }
  0xed   :  { %v194_v54 = vmax.f32 %v121_v51, 0.0 }
  0xee   :  { %196 = vst [vmem:[%s392_s3] sm:$0xff] %v193_v52  ;;  %198 = vst [vmem:[%s392_s3 + $0x10] sm:$0xff] %v195_v53 }
  0xef   :  { %197 = vst [vmem:[%s392_s3 + $0x8] sm:$0xff] %v194_v54 }

// kernel: _critic_forward.7
= control target key start
LH: loop header
LB: loop body
LE: loop exit
PB: predicated region body
PF: predicated region fallthrough
CT: control target
= control target key end

     0   :  { %vm1061_vm0 = vmmov 0   ;;  %s1598_s1 = inlined_call_operand.vmem [shape: f32[896,128], index: 1, kind: input, shape index: {}]   ;;  %s1599_s0 = inlined_call_operand.vmem [shape: f32[8,896], index: 0, kind: input, shape index: {}]   ;;  %s1600_s3 = inlined_call_operand.vmem [shape: f32[128,128], index: 3, kind: input, shape index: {}]   ;;  %s1601_s5 = inlined_call_operand.vmem [shape: f32[128,128], index: 5, kind: input, shape index: {}]   ;;  %s1602_s2 = inlined_call_operand.vmem [shape: f32[1,128], index: 2, kind: input, shape index: {}]   ;;  %s1603_s4 = inlined_call_operand.vmem [shape: f32[1,128], index: 4, kind: input, shape index: {}]   ;;  %s1604_s6 = inlined_call_operand.vmem [shape: f32[1,128], index: 6, kind: input, shape index: {}]   ;;  %s1605_s7 = inlined_call_operand.vmem [shape: f32[8,128], index: 7, kind: output, shape index: {}]  }
   0x1   :  { %v49_v0 = vld [vmem:[%s1598_s1 + $0x80] sm:$0xff]  ;;  %v50_v1 = vld [vmem:[%s1598_s1 + $0x88] sm:$0xff]  ;;  %v51_v11 = vld [vmem:[%s1598_s1 + $0x90] sm:$0xff] }
   0x2   :  { %v33_v2 = vld [vmem:[%s1598_s1] sm:$0xff]  ;;  %v889_v3 = vpack.c.bf16 %v50_v1, %v49_v0  ;;  %v34_v4 = vld [vmem:[%s1598_s1 + $0x8] sm:$0xff]  ;;  %v52_v13 = vld [vmem:[%s1598_s1 + $0x98] sm:$0xff] }
   0x3   :  { %v81_v5 = vld [vmem:[%s1598_s1 + $0x180] sm:$0xff]  ;;  %v82_v6 = vld [vmem:[%s1598_s1 + $0x188] sm:$0xff]  ;;  %v891_v7 = vpack.c.bf16 %v34_v4, %v33_v2  ;;  %v35_v14 = vld [vmem:[%s1598_s1 + $0x10] sm:$0xff]  ;;  %v893_v16 = vpack.c.bf16 %v52_v13, %v51_v11 }
   0x4   :  { %v921_v8 = vpack.c.bf16 %v82_v6, %v81_v5  ;;  %v65_v9 = vld [vmem:[%s1598_s1 + $0x100] sm:$0xff]  ;;  %v66_v10 = vld [vmem:[%s1598_s1 + $0x108] sm:$0xff]  ;;  %890 = vmatprep.subr.bf16.mxu0 %v889_v3  ;;  %v36_v15 = vld [vmem:[%s1598_s1 + $0x18] sm:$0xff] }
   0x5   :  { %v923_v12 = vpack.c.bf16 %v66_v10, %v65_v9  ;;  %892 = vmatpush3.bf16.msra.mxu0 %v891_v7  ;;  %v895_v17 = vpack.c.bf16 %v36_v15, %v35_v14  ;;  %v83_v18 = vld [vmem:[%s1598_s1 + $0x190] sm:$0xff]  ;;  %v84_v19 = vld [vmem:[%s1598_s1 + $0x198] sm:$0xff]  ;;  %v53_v23 = vld [vmem:[%s1598_s1 + $0xa0] sm:$0xff] }
   0x6   :  { %922 = vmatprep.subr.bf16.mxu1 %v921_v8  ;;  %v67_v20 = vld [vmem:[%s1598_s1 + $0x110] sm:$0xff]  ;;  %v925_v21 = vpack.c.bf16 %v84_v19, %v83_v18  ;;  %v68_v22 = vld [vmem:[%s1598_s1 + $0x118] sm:$0xff]  ;;  %v54_v24 = vld [vmem:[%s1598_s1 + $0xa8] sm:$0xff]  ;;  %894 = vmatprep.subr.bf16.mxu0 %v893_v16 }
   0x7   :  { %924 = vmatpush3.bf16.msra.mxu1 %v923_v12  ;;  %v927_v25 = vpack.c.bf16 %v68_v22, %v67_v20  ;;  %v897_v26 = vpack.c.bf16 %v54_v24, %v53_v23  ;;  %v37_v27 = vld [vmem:[%s1598_s1 + $0x20] sm:$0xff]  ;;  %v38_v28 = vld [vmem:[%s1598_s1 + $0x28] sm:$0xff]  ;;  %v55_v35 = vld [vmem:[%s1598_s1 + $0xb0] sm:$0xff] }
   0x8   :  { %v85_v29 = vld [vmem:[%s1598_s1 + $0x1a0] sm:$0xff]  ;;  %926 = vmatprep.subr.bf16.mxu1 %v925_v21  ;;  %v86_v30 = vld [vmem:[%s1598_s1 + $0x1a8] sm:$0xff]  ;;  %v899_v33 = vpack.c.bf16 %v38_v28, %v37_v27  ;;  %v56_v36 = vld [vmem:[%s1598_s1 + $0xb8] sm:$0xff] }
   0x9   :  { %v69_v31 = vld [vmem:[%s1598_s1 + $0x120] sm:$0xff]  ;;  %v70_v32 = vld [vmem:[%s1598_s1 + $0x128] sm:$0xff]  ;;  %896 = vmatpush3.bf16.msra.mxu0 %v895_v17  ;;  %v929_v34 = vpack.c.bf16 %v86_v30, %v85_v29  ;;  %v39_v37 = vld [vmem:[%s1598_s1 + $0x30] sm:$0xff]  ;;  %v901_v39 = vpack.c.bf16 %v56_v36, %v55_v35 }
   0xa   :  { %898 = vmatprep.subr.bf16.mxu0 %v897_v26  ;;  %v931_v38 = vpack.c.bf16 %v70_v32, %v69_v31  ;;  %v40_v40 = vld [vmem:[%s1598_s1 + $0x38] sm:$0xff]  ;;  %v87_v41 = vld [vmem:[%s1598_s1 + $0x1b0] sm:$0xff]  ;;  %v57_v46 = vld [vmem:[%s1598_s1 + $0xc0] sm:$0xff] }
   0xb   :  { %928 = vmatpush3.bf16.msra.mxu1 %v927_v25  ;;  %v88_v42 = vld [vmem:[%s1598_s1 + $0x1b8] sm:$0xff]  ;;  %v71_v44 = vld [vmem:[%s1598_s1 + $0x130] sm:$0xff]  ;;  %v58_v47 = vld [vmem:[%s1598_s1 + $0xc8] sm:$0xff]  ;;  %v903_v48 = vpack.c.bf16 %v40_v40, %v39_v37 }
   0xc   :  { %930 = vmatprep.subr.bf16.mxu1 %v929_v34  ;;  %v933_v43 = vpack.c.bf16 %v88_v42, %v87_v41  ;;  %v72_v45 = vld [vmem:[%s1598_s1 + $0x138] sm:$0xff]  ;;  %v89_v49 = vld [vmem:[%s1598_s1 + $0x1c0] sm:$0xff]  ;;  %v90_v50 = vld [vmem:[%s1598_s1 + $0x1c8] sm:$0xff]  ;;  %v905_v52 = vpack.c.bf16 %v58_v47, %v57_v46 }
   0xd   :  { %900 = vmatpush3.bf16.msra.mxu0 %v899_v33  ;;  %v935_v51 = vpack.c.bf16 %v72_v45, %v71_v44  ;;  %v41_v53 = vld [vmem:[%s1598_s1 + $0x40] sm:$0xff]  ;;  %v42_v54 = vld [vmem:[%s1598_s1 + $0x48] sm:$0xff]  ;;  %v937_v56 = vpack.c.bf16 %v90_v50, %v89_v49  ;;  %v59_v58 = vld [vmem:[%s1598_s1 + $0xd0] sm:$0xff] }
   0xe   :  { %902 = vmatprep.subr.bf16.mxu0 %v901_v39  ;;  %v73_v55 = vld [vmem:[%s1598_s1 + $0x140] sm:$0xff]  ;;  %v74_v57 = vld [vmem:[%s1598_s1 + $0x148] sm:$0xff]  ;;  %v60_v59 = vld [vmem:[%s1598_s1 + $0xd8] sm:$0xff]  ;;  %v907_v62 = vpack.c.bf16 %v42_v54, %v41_v53 }
   0xf   :  { %932 = vmatpush3.bf16.msra.mxu1 %v931_v38  ;;  %v91_v60 = vld [vmem:[%s1598_s1 + $0x1d0] sm:$0xff]  ;;  %v92_v61 = vld [vmem:[%s1598_s1 + $0x1d8] sm:$0xff]  ;;  %v939_v63 = vpack.c.bf16 %v74_v57, %v73_v55  ;;  %v909_v0 = vpack.c.bf16 %v60_v59, %v59_v58  ;;  %v61_v6 = vld [vmem:[%s1598_s1 + $0xe0] sm:$0xff] }
  0x10   :  { %934 = vmatprep.subr.bf16.mxu1 %v933_v43  ;;  %v43_v1 = vld [vmem:[%s1598_s1 + $0x50] sm:$0xff]  ;;  %v44_v2 = vld [vmem:[%s1598_s1 + $0x58] sm:$0xff]  ;;  %v941_v4 = vpack.c.bf16 %v92_v61, %v91_v60  ;;  %v62_v7 = vld [vmem:[%s1598_s1 + $0xe8] sm:$0xff] }
  0x11   :  { %904 = vmatpush3.bf16.msra.mxu0 %v903_v48  ;;  %v75_v3 = vld [vmem:[%s1598_s1 + $0x150] sm:$0xff]  ;;  %v76_v5 = vld [vmem:[%s1598_s1 + $0x158] sm:$0xff]  ;;  %v93_v8 = vld [vmem:[%s1598_s1 + $0x1e0] sm:$0xff]  ;;  %v911_v10 = vpack.c.bf16 %v44_v2, %v43_v1  ;;  %v913_v14 = vpack.c.bf16 %v62_v7, %v61_v6  ;;  %v1062_v1 = vmov 0.0  }
  0x12   :  { %906 = vmatprep.subr.bf16.mxu0 %v905_v52  ;;  %v94_v9 = vld [vmem:[%s1598_s1 + $0x1e8] sm:$0xff]  ;;  %v45_v11 = vld [vmem:[%s1598_s1 + $0x60] sm:$0xff]  ;;  %v943_v13 = vpack.c.bf16 %v76_v5, %v75_v3  ;;  %v63_v19 = vld [vmem:[%s1598_s1 + $0xf0] sm:$0xff] }
  0x13   :  { %936 = vmatpush3.bf16.msra.mxu1 %v935_v51  ;;  %v27_v12 = vld [vmem:[%s1599_s0 + $0x8] sm:$0xff]  ;;  %v77_v16 = vld [vmem:[%s1598_s1 + $0x160] sm:$0xff]  ;;  %v945_v18 = vpack.c.bf16 %v94_v9, %v93_v8  ;;  %v64_v20 = vld [vmem:[%s1598_s1 + $0xf8] sm:$0xff]  ;;  %v1060_v51 = vmov 0.0|0.0  }
  0x14   :  { %938 = vmatprep.subr.bf16.mxu1 %v937_v56  ;;  %v46_v15 = vld [vmem:[%s1598_s1 + $0x68] sm:$0xff]  ;;  %216 = vmatprep.mubr.f32.mxu0 %v27_v12  ;;  %v29_v21 = vld [vmem:[%s1599_s0 + $0x18] sm:$0xff]  ;;  %v95_v22 = vld [vmem:[%s1598_s1 + $0x1f0] sm:$0xff]  ;;  %v917_v26 = vpack.c.bf16 %v64_v20, %v63_v19 }
  0x15   :  { %908 = vmatpush3.bf16.msra.mxu0 %v907_v62  ;;  %v78_v17 = vld [vmem:[%s1598_s1 + $0x168] sm:$0xff]  ;;  %v96_v23 = vld [vmem:[%s1598_s1 + $0x1f8] sm:$0xff]  ;;  %286 = vmatprep.mubr.f32.mxu1 %v29_v21  ;;  %v915_v24 = vpack.c.bf16 %v46_v15, %v45_v11  ;;  %v47_v27 = vld [vmem:[%s1598_s1 + $0x70] sm:$0xff] }
  0x16   :  { %910 = vmatprep.subr.bf16.mxu0 %v909_v0  ;;  %v947_v25 = vpack.c.bf16 %v78_v17, %v77_v16  ;;  %v48_v28 = vld [vmem:[%s1598_s1 + $0x78] sm:$0xff]  ;;  %v79_v29 = vld [vmem:[%s1598_s1 + $0x170] sm:$0xff]  ;;  %v949_v30 = vpack.c.bf16 %v96_v23, %v95_v22  ;;  %v113_v32 = vld [vmem:[%s1598_s1 + $0x280] sm:$0xff] }
  0x17   :  { %940 = vmatpush3.bf16.msra.mxu1 %v939_v63  ;;  %v80_v31 = vld [vmem:[%s1598_s1 + $0x178] sm:$0xff]  ;;  %v114_v33 = vld [vmem:[%s1598_s1 + $0x288] sm:$0xff]  ;;  %v919_v34 = vpack.c.bf16 %v48_v28, %v47_v27  ;;  %v97_v37 = vld [vmem:[%s1598_s1 + $0x200] sm:$0xff] }
  0x18   :  { %942 = vmatprep.subr.bf16.mxu1 %v941_v4  ;;  %v951_v35 = vpack.c.bf16 %v80_v31, %v79_v29  ;;  %v953_v36 = vpack.c.bf16 %v114_v33, %v113_v32  ;;  %v98_v38 = vld [vmem:[%s1598_s1 + $0x208] sm:$0xff]  ;;  %v115_v39 = vld [vmem:[%s1598_s1 + $0x290] sm:$0xff]  ;;  %v116_v40 = vld [vmem:[%s1598_s1 + $0x298] sm:$0xff] }
  0x19   :  { %912 = vmatpush3.bf16.msra.mxu0 %v911_v10  ;;  %v129_v41 = vld [vmem:[%s1598_s1 + $0x300] sm:$0xff]  ;;  %v130_v42 = vld [vmem:[%s1598_s1 + $0x308] sm:$0xff]  ;;  %v955_v44 = vpack.c.bf16 %v98_v38, %v97_v37  ;;  %v28_v45 = vld [vmem:[%s1599_s0 + $0x10] sm:$0xff]  ;;  %v957_v46 = vpack.c.bf16 %v116_v40, %v115_v39 }
  0x1a   :  { %914 = vmatprep.subr.bf16.mxu0 %v913_v14  ;;  %v26_v43 = vld [vmem:[%s1599_s0] sm:$0xff]  ;;  %v99_v47 = vld [vmem:[%s1598_s1 + $0x210] sm:$0xff]  ;;  %v100_v48 = vld [vmem:[%s1598_s1 + $0x218] sm:$0xff]  ;;  %v986_v49 = vpack.c.bf16 %v130_v42, %v129_v41 }
  0x1b   :  { %944 = vmatpush3.bf16.msra.mxu1 %v943_v13  ;;  %v117_v50 = vld [vmem:[%s1598_s1 + $0x2a0] sm:$0xff]  ;;  %v118_v52 = vld [vmem:[%s1598_s1 + $0x2a8] sm:$0xff]  ;;  %v131_v53 = vld [vmem:[%s1598_s1 + $0x310] sm:$0xff]  ;;  %v959_v55 = vpack.c.bf16 %v100_v48, %v99_v47 }
  0x1c   :  { %946 = vmatprep.subr.bf16.mxu1 %v945_v18  ;;  %v132_v54 = vld [vmem:[%s1598_s1 + $0x318] sm:$0xff]  ;;  %v101_v56 = vld [vmem:[%s1598_s1 + $0x220] sm:$0xff]  ;;  %v961_v57 = vpack.c.bf16 %v118_v52, %v117_v50  ;;  %v102_v58 = vld [vmem:[%s1598_s1 + $0x228] sm:$0xff] }
  0x1d   :  { %916 = vmatpush3.bf16.msra.mxu0 %v915_v24  ;;  %v989_v59 = vpack.c.bf16 %v132_v54, %v131_v53  ;;  %v119_v60 = vld [vmem:[%s1598_s1 + $0x2b0] sm:$0xff]  ;;  %v120_v61 = vld [vmem:[%s1598_s1 + $0x2b8] sm:$0xff]  ;;  %v133_v62 = vld [vmem:[%s1598_s1 + $0x320] sm:$0xff]  ;;  %v963_v2 = vpack.c.bf16 %v102_v58, %v101_v56 }
  0x1e   :  { %918 = vmatprep.subr.bf16.mxu0 %v917_v26  ;;  %v134_v63 = vld [vmem:[%s1598_s1 + $0x328] sm:$0xff]  ;;  %v965_v3 = vpack.c.bf16 %v120_v61, %v119_v60  ;;  %v103_v4 = vld [vmem:[%s1598_s1 + $0x230] sm:$0xff]  ;;  %v104_v5 = vld [vmem:[%s1598_s1 + $0x238] sm:$0xff] }
  0x1f   :  { %948 = vmatpush3.bf16.msra.mxu1 %v947_v25  ;;  %v31_v0 = vld [vmem:[%s1599_s0 + $0x28] sm:$0xff]  ;;  %v992_v6 = vpack.c.bf16 %v134_v63, %v133_v62  ;;  %v121_v7 = vld [vmem:[%s1598_s1 + $0x2c0] sm:$0xff]  ;;  %v135_v9 = vld [vmem:[%s1598_s1 + $0x330] sm:$0xff]  ;;  %v967_v11 = vpack.c.bf16 %v104_v5, %v103_v4 }
  0x20   :  { %950 = vmatprep.subr.bf16.mxu1 %v949_v30  ;;  %v122_v8 = vld [vmem:[%s1598_s1 + $0x2c8] sm:$0xff]  ;;  %v136_v10 = vld [vmem:[%s1598_s1 + $0x338] sm:$0xff]  ;;  %v105_v13 = vld [vmem:[%s1598_s1 + $0x240] sm:$0xff] }
  0x21   :  { %920 = vmatpush3.bf16.msra.mxu0 %v919_v34  ;;  %v969_v12 = vpack.c.bf16 %v122_v8, %v121_v7  ;;  %v106_v14 = vld [vmem:[%s1598_s1 + $0x248] sm:$0xff]  ;;  %v995_v15 = vpack.c.bf16 %v136_v10, %v135_v9  ;;  %v123_v16 = vld [vmem:[%s1598_s1 + $0x2d0] sm:$0xff]  ;;  %v124_v17 = vld [vmem:[%s1598_s1 + $0x2d8] sm:$0xff] }
  0x22   :  { %954 = vmatprep.subr.bf16.mxu0 %v953_v36  ;;  %v137_v18 = vld [vmem:[%s1598_s1 + $0x340] sm:$0xff]  ;;  %v138_v19 = vld [vmem:[%s1598_s1 + $0x348] sm:$0xff]  ;;  %v971_v20 = vpack.c.bf16 %v106_v14, %v105_v13  ;;  %v973_v21 = vpack.c.bf16 %v124_v17, %v123_v16  ;;  %v107_v22 = vld [vmem:[%s1598_s1 + $0x250] sm:$0xff] }
  0x23   :  { %952 = vmatpush3.bf16.msra.mxu1 %v951_v35  ;;  %v108_v23 = vld [vmem:[%s1598_s1 + $0x258] sm:$0xff]  ;;  %v998_v24 = vpack.c.bf16 %v138_v19, %v137_v18  ;;  %v125_v25 = vld [vmem:[%s1598_s1 + $0x2e0] sm:$0xff]  ;;  %v126_v26 = vld [vmem:[%s1598_s1 + $0x2e8] sm:$0xff] }
  0x24   :  { %985 = vmatprep.subr.bf16.mxu1 %v1060_v51  ;;  %217 = vmatmul.mubr.f32.vlgmr.msra.gmra.mrb[0].mxu0 %v26_v43  ;;  %v139_v27 = vld [vmem:[%s1598_s1 + $0x350] sm:$0xff]  ;;  %v140_v28 = vld [vmem:[%s1598_s1 + $0x358] sm:$0xff]  ;;  %v975_v29 = vpack.c.bf16 %v108_v23, %v107_v22  ;;  %v977_v30 = vpack.c.bf16 %v126_v26, %v125_v25  ;;  %v109_v31 = vld [vmem:[%s1598_s1 + $0x260] sm:$0xff] }
  0x25   :  { %956 = vmatpush3.bf16.msra.mxu0 %v955_v44  ;;  %356 = vmatprep.mubr.f32.mxu0 %v31_v0  ;;  %v110_v32 = vld [vmem:[%s1598_s1 + $0x268] sm:$0xff]  ;;  %v1001_v33 = vpack.c.bf16 %v140_v28, %v139_v27  ;;  %v127_v34 = vld [vmem:[%s1598_s1 + $0x2f0] sm:$0xff]  ;;  %v128_v35 = vld [vmem:[%s1598_s1 + $0x2f8] sm:$0xff] }
  0x26   :  { %287 = vmatmul.mubr.f32.vlgmr.msra.gmra.mrb[0].mxu1 %v28_v45  ;;  %958 = vmatprep.subr.bf16.mxu0 %v957_v46  ;;  %v141_v36 = vld [vmem:[%s1598_s1 + $0x360] sm:$0xff]  ;;  %v142_v37 = vld [vmem:[%s1598_s1 + $0x368] sm:$0xff]  ;;  %v979_v38 = vpack.c.bf16 %v110_v32, %v109_v31  ;;  %v981_v39 = vpack.c.bf16 %v128_v35, %v127_v34  ;;  %v111_v40 = vld [vmem:[%s1598_s1 + $0x270] sm:$0xff] }
  0x27   :  { %987 = vmatpush3.bf16.msra.mxu1 %v986_v49  ;;  %816 = vmatprep.mubr.msk.f32.mxu1 %vm1061_vm0, %v1062_v1  ;;  %v112_v41 = vld [vmem:[%s1598_s1 + $0x278] sm:$0xff]  ;;  %v1004_v42 = vpack.c.bf16 %v142_v37, %v141_v36  ;;  %v143_v43 = vld [vmem:[%s1598_s1 + $0x370] sm:$0xff]  ;;  %v30_v47 = vld [vmem:[%s1599_s0 + $0x20] sm:$0xff] }
  0x28   :  { %988 = vmatprep.subr.bf16.mxu1 %v1060_v51  ;;  %v144_v44 = vld [vmem:[%s1598_s1 + $0x378] sm:$0xff]  ;;  %v983_v45 = vpack.c.bf16 %v112_v41, %v111_v40  ;;  %v32_v48 = vld [vmem:[%s1599_s0 + $0x30] sm:$0xff]  ;;  %v433_v49 = vld [vmem:[%s1600_s3] sm:$0xff] }
  0x29   :  { %960 = vmatpush3.bf16.msra.mxu0 %v959_v55  ;;  %v1007_v46 = vpack.c.bf16 %v144_v44, %v143_v43  ;;  %v434_v50 = vld [vmem:[%s1600_s3 + $0x8] sm:$0xff]  ;;  %v435_v52 = vld [vmem:[%s1600_s3 + $0x10] sm:$0xff]  ;;  %v436_v54 = vld [vmem:[%s1600_s3 + $0x18] sm:$0xff] }
  0x2a   :  { %962 = vmatprep.subr.bf16.mxu0 %v961_v57  ;;  %v1010_v53 = vpack.c.bf16 %v434_v50, %v433_v49  ;;  %v1013_v55 = vpack.c.bf16 %v436_v54, %v435_v52  ;;  %v437_v56 = vld [vmem:[%s1600_s3 + $0x20] sm:$0xff]  ;;  %v438_v57 = vld [vmem:[%s1600_s3 + $0x28] sm:$0xff]  ;;  %v440_v60 = vld [vmem:[%s1600_s3 + $0x38] sm:$0xff] }
  0x2b   :  { %990 = vmatpush3.bf16.msra.mxu1 %v989_v59  ;;  %v1016_v58 = vpack.c.bf16 %v438_v57, %v437_v56  ;;  %v439_v59 = vld [vmem:[%s1600_s3 + $0x30] sm:$0xff]  ;;  %v441_v62 = vld [vmem:[%s1600_s3 + $0x40] sm:$0xff]  ;;  %v442_v63 = vld [vmem:[%s1600_s3 + $0x48] sm:$0xff] }
  0x2c   :  { %991 = vmatprep.subr.bf16.mxu1 %v1060_v51  ;;  %v1019_v61 = vpack.c.bf16 %v440_v60, %v439_v59  ;;  %v1022_v0 = vpack.c.bf16 %v442_v63, %v441_v62  ;;  %v445_v4 = vld [vmem:[%s1600_s3 + $0x60] sm:$0xff]  ;;  %v446_v5 = vld [vmem:[%s1600_s3 + $0x68] sm:$0xff]  ;;  %v447_v7 = vld [vmem:[%s1600_s3 + $0x70] sm:$0xff] }
  0x2d   :  { %964 = vmatpush3.bf16.msra.mxu0 %v963_v2  ;;  %v444_v2 = vld [vmem:[%s1600_s3 + $0x58] sm:$0xff]  ;;  %v527_v10 = vld [vmem:[%s1601_s5] sm:$0xff]  ;;  %v532_v17 = vld [vmem:[%s1601_s5 + $0x28] sm:$0xff] }
  0x2e   :  { %966 = vmatprep.subr.bf16.mxu0 %v965_v3  ;;  %v448_v8 = vld [vmem:[%s1600_s3 + $0x78] sm:$0xff]  ;;  %v531_v16 = vld [vmem:[%s1601_s5 + $0x20] sm:$0xff]  ;;  %v533_v19 = vld [vmem:[%s1601_s5 + $0x30] sm:$0xff] }
  0x2f   :  { %993 = vmatpush3.bf16.msra.mxu1 %v992_v6  ;;  %v1028_v6 = vpack.c.bf16 %v446_v5, %v445_v4  ;;  %v1031_v9 = vpack.c.bf16 %v448_v8, %v447_v7  ;;  %v530_v14 = vld [vmem:[%s1601_s5 + $0x18] sm:$0xff]  ;;  %v1040_v18 = vpack.c.bf16 %v532_v17, %v531_v16  ;;  %v535_v22 = vld [vmem:[%s1601_s5 + $0x40] sm:$0xff]  ;;  %v536_v23 = vld [vmem:[%s1601_s5 + $0x48] sm:$0xff] }
  0x30   :  { %994 = vmatprep.subr.bf16.mxu1 %v1060_v51  ;;  %v537_v25 = vld [vmem:[%s1601_s5 + $0x50] sm:$0xff]  ;;  %v538_v26 = vld [vmem:[%s1601_s5 + $0x58] sm:$0xff]  ;;  %v539_v28 = vld [vmem:[%s1601_s5 + $0x60] sm:$0xff] }
  0x31   :  { %968 = vmatpush3.bf16.msra.mxu0 %v967_v11  ;;  %v528_v11 = vld [vmem:[%s1601_s5 + $0x8] sm:$0xff]  ;;  %v1049_v27 = vpack.c.bf16 %v538_v26, %v537_v25  ;;  %v625_v32 = vld [vmem:[%s1602_s2] ss:$0 sm:$0xff] }
  0x32   :  { %970 = vmatprep.subr.bf16.mxu0 %v969_v12  ;;  %v529_v12 = vld [vmem:[%s1601_s5 + $0x10] sm:$0xff]  ;;  %v1034_v13 = vpack.c.bf16 %v528_v11, %v527_v10  ;;  %v626_v50 = vld [vmem:[%s1603_s4] ss:$0 sm:$0xff] }
  0x33   :  { %996 = vmatpush3.bf16.msra.mxu1 %v995_v15  ;;  %v1037_v15 = vpack.c.bf16 %v530_v14, %v529_v12  ;;  %v627_v56 = vld [vmem:[%s1604_s6] ss:$0 sm:$0xff] }
  0x34   :  { %997 = vmatprep.subr.bf16.mxu1 %v1060_v51 }
  0x35   :  { %972 = vmatpush3.bf16.msra.mxu0 %v971_v20  ;;  %v534_v20 = vld [vmem:[%s1601_s5 + $0x38] sm:$0xff] }
  0x36   :  { %974 = vmatprep.subr.bf16.mxu0 %v973_v21  ;;  %v1043_v21 = vpack.c.bf16 %v534_v20, %v533_v19 }
  0x37   :  { %999 = vmatpush3.bf16.msra.mxu1 %v998_v24  ;;  %v1046_v24 = vpack.c.bf16 %v536_v23, %v535_v22 }
  0x38   :  { %1000 = vmatprep.subr.bf16.mxu1 %v1060_v51 }
  0x39   :  { %976 = vmatpush3.bf16.msra.mxu0 %v975_v29  ;;  %v540_v29 = vld [vmem:[%s1601_s5 + $0x68] sm:$0xff] }
  0x3a   :  { %978 = vmatprep.subr.bf16.mxu0 %v977_v30  ;;  %v1052_v30 = vpack.c.bf16 %v540_v29, %v539_v28 }
  0x3b   :  { %1002 = vmatpush3.bf16.msra.mxu1 %v1001_v33 }
  0x3c   :  { %1003 = vmatprep.subr.bf16.mxu1 %v1060_v51 }
  0x3d   :  { %980 = vmatpush3.bf16.msra.mxu0 %v979_v38 }
  0x3e   :  { %982 = vmatprep.subr.bf16.mxu0 %v981_v39 }
  0x3f   :  { %1005 = vmatpush3.bf16.msra.mxu1 %v1004_v42 }
  0x40   :  { %1006 = vmatprep.subr.bf16.mxu1 %v1060_v51 }
  0x41   :  { %984 = vmatpush3.bf16.msra.mxu0 %v983_v45 }
  0x42   :  { %1009 = vmatprep.subr.bf16.mxu0 %v1060_v51 }
  0x43   :  { %1008 = vmatpush3.bf16.msra.mxu1 %v1007_v46 }
  0x44   :  { %1033 = vmatprep.subr.bf16.mxu1 %v1060_v51  ;;  %357 = vmatmul.mubr.f32.vlgmr.msra.gmra.mrb[2].mxu0 %v30_v47  ;;  %v541_v47 = vld [vmem:[%s1601_s5 + $0x70] sm:$0xff] }
  0x45   :  { %851 = vmatprep.mubr.msk.f32.mxu0 %vm1061_vm0, %v1062_v1  ;;  %1011 = vmatpush3.bf16.msra.mxu0 %v1010_v53 }
  0x46   :  { %817 = vmatmul.mubr.f32.vlgmr.msra.gmra.mrb[2].mxu1 %v32_v48  ;;  %1012 = vmatprep.subr.bf16.mxu0 %v1060_v51  ;;  %v542_v48 = vld [vmem:[%s1601_s5 + $0x78] sm:$0xff] }
  0x47   :  { %886 = vmatprep.mubr.msk.f32.mxu1 %vm1061_vm0, %v1062_v1  ;;  %v443_v1 = vld [vmem:[%s1600_s3 + $0x50] sm:$0xff]  ;;  %1035 = vmatpush3.bf16.msra.mxu1 %v1034_v13  ;;  %v1055_v49 = vpack.c.bf16 %v542_v48, %v541_v47 }
  0x48   :  { %v1025_v3 = vpack.c.bf16 %v444_v2, %v443_v1  ;;  %1036 = vmatprep.subr.bf16.mxu1 %v1060_v51 }
  0x49   :  { %1014 = vmatpush3.bf16.msra.mxu0 %v1013_v55 }
  0x4a   :  { %1015 = vmatprep.subr.bf16.mxu0 %v1060_v51 }
  0x4b   :  { %1038 = vmatpush3.bf16.msra.mxu1 %v1037_v15 }
  0x4c   :  { %1039 = vmatprep.subr.bf16.mxu1 %v1060_v51 }
  0x4d   :  { %1017 = vmatpush3.bf16.msra.mxu0 %v1016_v58 }
  0x4e   :  { %1018 = vmatprep.subr.bf16.mxu0 %v1060_v51 }
  0x4f   :  { %1041 = vmatpush3.bf16.msra.mxu1 %v1040_v18 }
  0x50   :  { %1042 = vmatprep.subr.bf16.mxu1 %v1060_v51 }
  0x51   :  { %1020 = vmatpush3.bf16.msra.mxu0 %v1019_v61 }
  0x52   :  { %1021 = vmatprep.subr.bf16.mxu0 %v1060_v51 }
  0x53   :  { %1044 = vmatpush3.bf16.msra.mxu1 %v1043_v21 }
  0x54   :  { %1045 = vmatprep.subr.bf16.mxu1 %v1060_v51 }
  0x55   :  { %1023 = vmatpush3.bf16.msra.mxu0 %v1022_v0 }
  0x56   :  { %1024 = vmatprep.subr.bf16.mxu0 %v1060_v51 }
  0x57   :  { %1047 = vmatpush3.bf16.msra.mxu1 %v1046_v24 }
  0x58   :  { %1048 = vmatprep.subr.bf16.mxu1 %v1060_v51 }
  0x59   :  { %1026 = vmatpush3.bf16.msra.mxu0 %v1025_v3 }
  0x5a   :  { %1027 = vmatprep.subr.bf16.mxu0 %v1060_v51 }
  0x5b   :  { %1050 = vmatpush3.bf16.msra.mxu1 %v1049_v27 }
  0x5c   :  { %1051 = vmatprep.subr.bf16.mxu1 %v1060_v51 }
  0x5d   :  { %1029 = vmatpush3.bf16.msra.mxu0 %v1028_v6 }
  0x5e   :  { %1030 = vmatprep.subr.bf16.mxu0 %v1060_v51 }
  0x5f   :  { %1053 = vmatpush3.bf16.msra.mxu1 %v1052_v30 }
  0x60   :  { %1054 = vmatprep.subr.bf16.mxu1 %v1060_v51 }
  0x61   :  { %1032 = vmatpush3.bf16.msra.mxu0 %v1031_v9 }
  0x63   :  { %1056 = vmatpush3.bf16.msra.mxu1 %v1055_v49 }
  0xf7   :  { %v660_v31 = vpop.f32.mrb[0].mxu0 }
  0xf8   :  { %v661_v33 = vpop.f32.mrb[1].mxu0 }
  0xf9   :  { %v695_v34 = vpop.f32.mrb[0].mxu1  ;;  %v662_v35 = vadd.f32 %v661_v33, %v660_v31 }
  0xfa   :  { %v696_v36 = vpop.f32.mrb[1].mxu1 }
  0xfb   :  { %v697_v37 = vadd.f32 %v696_v36, %v695_v34  ;;  %v219_v38 = vadd.f32 %v662_v35, %v625_v32 }
  0xfd   :  { %v289_v39 = vadd.f32 %v697_v37, %v219_v38 }
 0x117   :  { %v730_v40 = vpop.f32.mrb[2].mxu0 }
 0x118   :  { %v731_v41 = vpop.f32.mrb[3].mxu0 }
 0x119   :  { %v428_v42 = vpop.f32.mrb[2].mxu1  ;;  %v732_v43 = vadd.f32 %v731_v41, %v730_v40 }
 0x11a   :  { %v818_v44 = vpop.f32.mrb[3].mxu1 }
 0x11b   :  { %v359_v45 = vadd.f32 %v732_v43, %v289_v39 }
 0x11d   :  { %v429_v46 = vadd.f32 %v428_v42, %v359_v45 }
 0x11f   :  { %v432_v51 = vmax.f32 %v429_v46, 0.0 }
 0x121   :  { %852 = vmatmul.mubr.f32.vlgmr.msra.gmra.mrb[4].mxu0 %v432_v51 }
 0x1f4   :  { %v522_v52 = vpop.f32.mrb[4].mxu0 }
 0x1f5   :  { %v523_v53 = vadd.f32 %v626_v50, %v522_v52  ;;  %v853_v54 = vpop.f32.mrb[5].mxu0 }
 0x1f7   :  { %v526_v55 = vmax.f32 %v523_v53, 0.0 }
 0x1f9   :  { %887 = vmatmul.mubr.f32.vlgmr.msra.gmra.mrb[4].mxu1 %v526_v55 }
 0x2cc   :  { %v616_v57 = vpop.f32.mrb[4].mxu1 }
 0x2cd   :  { %v617_v58 = vadd.f32 %v627_v56, %v616_v57  ;;  %v888_v59 = vpop.f32.mrb[5].mxu1 }
 0x2cf   :  { %620 = vst [vmem:[%s1605_s7] sm:$0xff] %v617_v58 }

</bundles_post_ra>
